<compile_context>
chip_gen: v6e
topology: v6e:2x2x1
jax: 0.10.0
libtpu: 0.0.40
codegen_flags: <defaults>
</compile_context>

<pallas_src>
import jax
import jax.numpy as jnp
from jax.experimental import pallas as pl
from jax.experimental.pallas import tpu as pltpu

EPS = 1e-5
LANE = 128
SUBLANE = 8


# ----------------------------------------------------------------------------
# Kernel: full fused forward (logits only) for one batch tile.
# ----------------------------------------------------------------------------
def mlp_kernel(x_ref,
               w1, c1, w2, c2, w3, c3, w4, c4, w5, c5,
               w6, b6,
               o_ref):
    def block(x_bf16, w_ref, c_ref):
        # bf16 x bf16 -> f32 accumulate on the MXU.
        y = jnp.dot(x_bf16, w_ref[...], preferred_element_type=jnp.float32)
        # Folded-BN shift + ReLU in f32 (v5e has no bf16 VPU), then back to
        # bf16 for the next matmul's operands.
        y = jnp.maximum(y + c_ref[...], 0.0)
        return y.astype(jnp.bfloat16)

    x = x_ref[...]                       # (TM, F0_pad) bf16
    x = block(x, w1, c1)
    x = block(x, w2, c2)
    x = block(x, w3, c3)
    x = block(x, w4, c4)
    x = block(x, w5, c5)
    logits = jnp.dot(x, w6[...], preferred_element_type=jnp.float32) + b6[...]
    # Raw logits out (bf16 to halve writeback); sigmoid is applied in the
    # wrapper on the 2 useful columns only.
    o_ref[...] = logits.astype(o_ref.dtype)


# ----------------------------------------------------------------------------
# Parameter construction (deterministic synthetic params matching MyNet shapes)
# ----------------------------------------------------------------------------
def init_params(key, in_features):
    dims = [in_features, 120, 160, 120, 80, 20, 2]
    params = []
    for i in range(6):
        fan_in, fan_out = dims[i], dims[i + 1]
        key, kw, kb, kg, kbeta, km, kv = jax.random.split(key, 7)
        w = jax.random.normal(kw, (fan_in, fan_out), jnp.float32) * (1.0 / jnp.sqrt(fan_in))
        b = jax.random.normal(kb, (fan_out,), jnp.float32) * 0.1
        if i < 5:  # layers 1..5 have a BatchNorm1d following them
            gamma = 1.0 + 0.1 * jax.random.normal(kg, (fan_out,), jnp.float32)
            beta = 0.1 * jax.random.normal(kbeta, (fan_out,), jnp.float32)
            run_mean = 0.1 * jax.random.normal(km, (fan_out,), jnp.float32)
            run_var = 1.0 + 0.1 * jnp.abs(jax.random.normal(kv, (fan_out,), jnp.float32))
            params.append(dict(w=w, b=b, gamma=gamma, beta=beta,
                               mean=run_mean, var=run_var))
        else:
            params.append(dict(w=w, b=b))
    return params


def fold_bn(layer):
    """Fold Linear bias + BatchNorm1d (eval) into (scale, shift) vectors."""
    inv_std = 1.0 / jnp.sqrt(layer["var"] + EPS)
    scale = layer["gamma"] * inv_std
    shift = (layer["b"] - layer["mean"]) * scale + layer["beta"]
    return scale, shift


# ----------------------------------------------------------------------------
# Wrapper: padding, BN folding, bf16 cast, grid / BlockSpec construction.
# ----------------------------------------------------------------------------
def _round_up(n, m):
    return (n + m - 1) // m * m


def _pad2(a, rows, cols):
    return jnp.pad(a, ((0, rows - a.shape[0]), (0, cols - a.shape[1])))


def _choose_tm(batch, tm_cap):
    """Pick a batch tile: sublane-aligned power of two, <= tm_cap, with
    <=~12.5% padded rows, and >=2 grid steps when the batch allows it
    (so v7x megacore can shard the parallel batch axis)."""
    b_sub = _round_up(max(batch, 1), SUBLANE)
    best = SUBLANE
    t = SUBLANE
    while t <= tm_cap:
        b_pad = _round_up(b_sub, t)
        pad_ok = (b_pad - b_sub) * 8 <= b_sub           # <= 12.5% extra rows
        steps_ok = (b_pad // t) >= 2 or b_sub <= SUBLANE
        if pad_ok and steps_ok:
            best = t
        t *= 2
    return best


def mynet_forward(x, params, *, tm=2048):
    B, f_in = x.shape
    dims = [f_in, 120, 160, 120, 80, 20, 2]
    pdims = [_round_up(d, LANE) for d in dims]

    # --- prepare weights: fold BN scale into W, pad to lane multiples, bf16 ---
    kernel_args = []
    for i in range(6):
        p = params[i]
        w = p["w"]
        if i < 5:
            scale, shift = fold_bn(p)
            w = w * scale[None, :]          # BN scale folded into the weights
        else:
            shift = p["b"]
        w_pad = _pad2(w, pdims[i], pdims[i + 1]).astype(jnp.bfloat16)
        c_pad = jnp.pad(shift, (0, pdims[i + 1] - shift.shape[0]))
        kernel_args += [w_pad, c_pad.reshape(1, -1).astype(jnp.float32)]

    # --- pick batch tile, pad batch + input features, cast to bf16 ---
    TM = _choose_tm(B, tm)
    B_pad = _round_up(_round_up(B, SUBLANE), TM)
    x_pad = jnp.pad(x, ((0, B_pad - B), (0, pdims[0] - f_in))).astype(jnp.bfloat16)

    grid = (B_pad // TM,)

    in_specs = [pl.BlockSpec((TM, pdims[0]), lambda i: (i, 0))]
    for a in kernel_args:
        # Constant index_map: parameters stay resident in VMEM across the
        # grid; single-buffered since they never change.
        in_specs.append(pl.BlockSpec(a.shape, lambda i: (0, 0),
                                     pipeline_mode=pl.Buffered(1)))

    flops = 2 * B_pad * sum(pdims[i] * pdims[i + 1] for i in range(6))
    bytes_accessed = (
        sum(int(a.size) * a.dtype.itemsize for a in kernel_args)  # params
        + int(x_pad.size) * 2                                     # bf16 input
        + B_pad * pdims[6] * 2                                    # bf16 logits out
    )

    out = pl.pallas_call(
        mlp_kernel,
        out_shape=jax.ShapeDtypeStruct((B_pad, pdims[6]), jnp.bfloat16),
        grid=grid,
        in_specs=in_specs,
        out_specs=pl.BlockSpec((TM, pdims[6]), lambda i: (i, 0)),
        compiler_params=pltpu.CompilerParams(
            dimension_semantics=("parallel",),
            vmem_limit_bytes=32 * 1024 * 1024),
        cost_estimate=pl.CostEstimate(
            flops=flops,
            transcendentals=0,
            bytes_accessed=bytes_accessed),
    )(x_pad, *kernel_args)

    # Slice the 2 useful columns / B useful rows, then apply sigmoid on just
    # B*2 elements (instead of all TM*128 padded lanes inside the kernel).
    logits = out[:B, :2].astype(jnp.float32)
    return jax.nn.sigmoid(logits)


# ----------------------------------------------------------------------------
# Pure-JAX reference (f32 everywhere) for correctness checking.
# ----------------------------------------------------------------------------
def mynet_reference(x, params):
    for i in range(5):
        p = params[i]
        y = x @ p["w"] + p["b"]
        y = (y - p["mean"]) / jnp.sqrt(p["var"] + EPS) * p["gamma"] + p["beta"]
        x = jnp.maximum(y, 0.0)
    logits = x @ params[5]["w"] + params[5]["b"]
    return jax.nn.sigmoid(logits)


if __name__ == "__main__":
    key = jax.random.PRNGKey(0)
    k_param, k_x = jax.random.split(key)

    B, IN_FEATURES = 256, 32
    params = init_params(k_param, IN_FEATURES)
    x = jax.random.normal(k_x, (B, IN_FEATURES), jnp.float32)

    # At B=256 the adaptive tile picker chooses TM=128 (2 grid steps, zero
    # padding); at large B it grows the tile up to the 2048 cap.
    out = mynet_forward(x, params)
    out = jax.block_until_ready(out)

    ref = mynet_reference(x, params)
    assert out.shape == (B, 2), out.shape
    max_err = float(jnp.max(jnp.abs(out - ref)))
    # bf16 matmul operands (f32 accumulate) over 6 layers + bf16 logits
    # writeback -> relax tolerance.
    assert max_err < 3e-2, f"mismatch vs reference: max abs err {max_err}"

    print("KERNEL_OK")
</pallas_src>

<mosaic_0001>
module attributes {stable_mosaic.version = 11 : i64} {
  func.func @mlp_kernel(%arg0: i32, %arg1: memref<128x128xbf16, #tpu.memory_space<vmem>>, %arg2: memref<128x128xbf16, #tpu.memory_space<vmem>>, %arg3: memref<1x128xf32, #tpu.memory_space<vmem>>, %arg4: memref<128x256xbf16, #tpu.memory_space<vmem>>, %arg5: memref<1x256xf32, #tpu.memory_space<vmem>>, %arg6: memref<256x128xbf16, #tpu.memory_space<vmem>>, %arg7: memref<1x128xf32, #tpu.memory_space<vmem>>, %arg8: memref<128x128xbf16, #tpu.memory_space<vmem>>, %arg9: memref<1x128xf32, #tpu.memory_space<vmem>>, %arg10: memref<128x128xbf16, #tpu.memory_space<vmem>>, %arg11: memref<1x128xf32, #tpu.memory_space<vmem>>, %arg12: memref<128x128xbf16, #tpu.memory_space<vmem>>, %arg13: memref<1x128xf32, #tpu.memory_space<vmem>>, %arg14: memref<128x128xbf16, #tpu.memory_space<vmem>>) attributes {dimension_semantics = [#tpu.dimension_semantics<parallel>], iteration_bounds = array<i64: 2>, scalar_prefetch = 0 : i64, scratch_operands = 0 : i64, tpu.core_type = #tpu.core_type<tc>, window_params = [{transform_indices = @transform_0, window_bounds = array<i64: 128, 128>}, {pipeline_mode = #tpu.pipeline_mode<synchronous>, transform_indices = @transform_1, window_bounds = array<i64: 128, 128>}, {pipeline_mode = #tpu.pipeline_mode<synchronous>, transform_indices = @transform_2, window_bounds = array<i64: 1, 128>}, {pipeline_mode = #tpu.pipeline_mode<synchronous>, transform_indices = @transform_3, window_bounds = array<i64: 128, 256>}, {pipeline_mode = #tpu.pipeline_mode<synchronous>, transform_indices = @transform_4, window_bounds = array<i64: 1, 256>}, {pipeline_mode = #tpu.pipeline_mode<synchronous>, transform_indices = @transform_5, window_bounds = array<i64: 256, 128>}, {pipeline_mode = #tpu.pipeline_mode<synchronous>, transform_indices = @transform_6, window_bounds = array<i64: 1, 128>}, {pipeline_mode = #tpu.pipeline_mode<synchronous>, transform_indices = @transform_7, window_bounds = array<i64: 128, 128>}, {pipeline_mode = #tpu.pipeline_mode<synchronous>, transform_indices = @transform_8, window_bounds = array<i64: 1, 128>}, {pipeline_mode = #tpu.pipeline_mode<synchronous>, transform_indices = @transform_9, window_bounds = array<i64: 128, 128>}, {pipeline_mode = #tpu.pipeline_mode<synchronous>, transform_indices = @transform_10, window_bounds = array<i64: 1, 128>}, {pipeline_mode = #tpu.pipeline_mode<synchronous>, transform_indices = @transform_11, window_bounds = array<i64: 128, 128>}, {pipeline_mode = #tpu.pipeline_mode<synchronous>, transform_indices = @transform_12, window_bounds = array<i64: 1, 128>}, {transform_indices = @transform_13, window_bounds = array<i64: 128, 128>}]} {
    %c0 = arith.constant 0 : index
    %c0_0 = arith.constant 0 : index
    %0 = vector.load %arg1[%c0, %c0_0] : memref<128x128xbf16, #tpu.memory_space<vmem>>, vector<128x128xbf16>
    %c0_1 = arith.constant 0 : index
    %c0_2 = arith.constant 0 : index
    %1 = vector.load %arg2[%c0_1, %c0_2] : memref<128x128xbf16, #tpu.memory_space<vmem>>, vector<128x128xbf16>
    %cst = arith.constant dense<0.000000e+00> : vector<128x128xf32>
    %2 = tpu.matmul %0, %1, %cst {dimension_numbers = #tpu.dot_dimension_numbers<[1], [0], [0], [1], [0, 0, 1, 1], [], []>} : vector<128x128xbf16>, vector<128x128xbf16>, vector<128x128xf32> -> vector<128x128xf32>
    %c0_3 = arith.constant 0 : index
    %c0_4 = arith.constant 0 : index
    %3 = vector.load %arg3[%c0_3, %c0_4] : memref<1x128xf32, #tpu.memory_space<vmem>>, vector<1x128xf32>
    %4 = vector.broadcast %3 : vector<1x128xf32> to vector<128x128xf32>
    %5 = arith.addf %2, %4 : vector<128x128xf32>
    %cst_5 = arith.constant 0.000000e+00 : f32
    %6 = vector.broadcast %cst_5 : f32 to vector<128x128xf32>
    %7 = arith.maximumf %5, %6 : vector<128x128xf32>
    %8 = arith.truncf %7 : vector<128x128xf32> to vector<128x128xbf16>
    %c0_6 = arith.constant 0 : index
    %c0_7 = arith.constant 0 : index
    %9 = vector.load %arg4[%c0_6, %c0_7] : memref<128x256xbf16, #tpu.memory_space<vmem>>, vector<128x256xbf16>
    %cst_8 = arith.constant dense<0.000000e+00> : vector<128x256xf32>
    %10 = tpu.matmul %8, %9, %cst_8 {dimension_numbers = #tpu.dot_dimension_numbers<[1], [0], [0], [1], [0, 0, 1, 1], [], []>} : vector<128x128xbf16>, vector<128x256xbf16>, vector<128x256xf32> -> vector<128x256xf32>
    %c0_9 = arith.constant 0 : index
    %c0_10 = arith.constant 0 : index
    %11 = vector.load %arg5[%c0_9, %c0_10] : memref<1x256xf32, #tpu.memory_space<vmem>>, vector<1x256xf32>
    %12 = vector.broadcast %11 : vector<1x256xf32> to vector<128x256xf32>
    %13 = arith.addf %10, %12 : vector<128x256xf32>
    %cst_11 = arith.constant 0.000000e+00 : f32
    %14 = vector.broadcast %cst_11 : f32 to vector<128x256xf32>
    %15 = arith.maximumf %13, %14 : vector<128x256xf32>
    %16 = arith.truncf %15 : vector<128x256xf32> to vector<128x256xbf16>
    %c0_12 = arith.constant 0 : index
    %c0_13 = arith.constant 0 : index
    %17 = vector.load %arg6[%c0_12, %c0_13] : memref<256x128xbf16, #tpu.memory_space<vmem>>, vector<256x128xbf16>
    %cst_14 = arith.constant dense<0.000000e+00> : vector<128x128xf32>
    %18 = tpu.matmul %16, %17, %cst_14 {dimension_numbers = #tpu.dot_dimension_numbers<[1], [0], [0], [1], [0, 0, 1, 1], [], []>} : vector<128x256xbf16>, vector<256x128xbf16>, vector<128x128xf32> -> vector<128x128xf32>
    %c0_15 = arith.constant 0 : index
    %c0_16 = arith.constant 0 : index
    %19 = vector.load %arg7[%c0_15, %c0_16] : memref<1x128xf32, #tpu.memory_space<vmem>>, vector<1x128xf32>
    %20 = vector.broadcast %19 : vector<1x128xf32> to vector<128x128xf32>
    %21 = arith.addf %18, %20 : vector<128x128xf32>
    %cst_17 = arith.constant 0.000000e+00 : f32
    %22 = vector.broadcast %cst_17 : f32 to vector<128x128xf32>
    %23 = arith.maximumf %21, %22 : vector<128x128xf32>
    %24 = arith.truncf %23 : vector<128x128xf32> to vector<128x128xbf16>
    %c0_18 = arith.constant 0 : index
    %c0_19 = arith.constant 0 : index
    %25 = vector.load %arg8[%c0_18, %c0_19] : memref<128x128xbf16, #tpu.memory_space<vmem>>, vector<128x128xbf16>
    %cst_20 = arith.constant dense<0.000000e+00> : vector<128x128xf32>
    %26 = tpu.matmul %24, %25, %cst_20 {dimension_numbers = #tpu.dot_dimension_numbers<[1], [0], [0], [1], [0, 0, 1, 1], [], []>} : vector<128x128xbf16>, vector<128x128xbf16>, vector<128x128xf32> -> vector<128x128xf32>
    %c0_21 = arith.constant 0 : index
    %c0_22 = arith.constant 0 : index
    %27 = vector.load %arg9[%c0_21, %c0_22] : memref<1x128xf32, #tpu.memory_space<vmem>>, vector<1x128xf32>
    %28 = vector.broadcast %27 : vector<1x128xf32> to vector<128x128xf32>
    %29 = arith.addf %26, %28 : vector<128x128xf32>
    %cst_23 = arith.constant 0.000000e+00 : f32
    %30 = vector.broadcast %cst_23 : f32 to vector<128x128xf32>
    %31 = arith.maximumf %29, %30 : vector<128x128xf32>
    %32 = arith.truncf %31 : vector<128x128xf32> to vector<128x128xbf16>
    %c0_24 = arith.constant 0 : index
    %c0_25 = arith.constant 0 : index
    %33 = vector.load %arg10[%c0_24, %c0_25] : memref<128x128xbf16, #tpu.memory_space<vmem>>, vector<128x128xbf16>
    %cst_26 = arith.constant dense<0.000000e+00> : vector<128x128xf32>
    %34 = tpu.matmul %32, %33, %cst_26 {dimension_numbers = #tpu.dot_dimension_numbers<[1], [0], [0], [1], [0, 0, 1, 1], [], []>} : vector<128x128xbf16>, vector<128x128xbf16>, vector<128x128xf32> -> vector<128x128xf32>
    %c0_27 = arith.constant 0 : index
    %c0_28 = arith.constant 0 : index
    %35 = vector.load %arg11[%c0_27, %c0_28] : memref<1x128xf32, #tpu.memory_space<vmem>>, vector<1x128xf32>
    %36 = vector.broadcast %35 : vector<1x128xf32> to vector<128x128xf32>
    %37 = arith.addf %34, %36 : vector<128x128xf32>
    %cst_29 = arith.constant 0.000000e+00 : f32
    %38 = vector.broadcast %cst_29 : f32 to vector<128x128xf32>
    %39 = arith.maximumf %37, %38 : vector<128x128xf32>
    %40 = arith.truncf %39 : vector<128x128xf32> to vector<128x128xbf16>
    %c0_30 = arith.constant 0 : index
    %c0_31 = arith.constant 0 : index
    %41 = vector.load %arg12[%c0_30, %c0_31] : memref<128x128xbf16, #tpu.memory_space<vmem>>, vector<128x128xbf16>
    %cst_32 = arith.constant dense<0.000000e+00> : vector<128x128xf32>
    %42 = tpu.matmul %40, %41, %cst_32 {dimension_numbers = #tpu.dot_dimension_numbers<[1], [0], [0], [1], [0, 0, 1, 1], [], []>} : vector<128x128xbf16>, vector<128x128xbf16>, vector<128x128xf32> -> vector<128x128xf32>
    %c0_33 = arith.constant 0 : index
    %c0_34 = arith.constant 0 : index
    %43 = vector.load %arg13[%c0_33, %c0_34] : memref<1x128xf32, #tpu.memory_space<vmem>>, vector<1x128xf32>
    %44 = vector.broadcast %43 : vector<1x128xf32> to vector<128x128xf32>
    %45 = arith.addf %42, %44 : vector<128x128xf32>
    %46 = arith.truncf %45 : vector<128x128xf32> to vector<128x128xbf16>
    %c0_35 = arith.constant 0 : index
    %c0_36 = arith.constant 0 : index
    %47 = vector.load %arg14[%c0_35, %c0_36] : memref<128x128xbf16, #tpu.memory_space<vmem>>, vector<128x128xbf16>
    tpu.vector_store %arg14[%c0_35, %c0_36], %46 {strides = array<i32>} : memref<128x128xbf16, #tpu.memory_space<vmem>>, vector<128x128xbf16>,
    return
  }
  func.func @transform_0(%arg0: i32) -> (i32, i32) {
    %c0_i32 = arith.constant 0 : i32
    %c0_i32_0 = arith.constant 0 : i32
    return %arg0, %c0_i32 : i32, i32
  }
  func.func @transform_1(%arg0: i32) -> (i32, i32) {
    %c0_i32 = arith.constant 0 : i32
    %c0_i32_0 = arith.constant 0 : i32
    %c0_i32_1 = arith.constant 0 : i32
    return %c0_i32, %c0_i32_0 : i32, i32
  }
  func.func @transform_2(%arg0: i32) -> (i32, i32) {
    %c0_i32 = arith.constant 0 : i32
    %c0_i32_0 = arith.constant 0 : i32
    %c0_i32_1 = arith.constant 0 : i32
    return %c0_i32, %c0_i32_0 : i32, i32
  }
  func.func @transform_3(%arg0: i32) -> (i32, i32) {
    %c0_i32 = arith.constant 0 : i32
    %c0_i32_0 = arith.constant 0 : i32
    %c0_i32_1 = arith.constant 0 : i32
    return %c0_i32, %c0_i32_0 : i32, i32
  }
  func.func @transform_4(%arg0: i32) -> (i32, i32) {
    %c0_i32 = arith.constant 0 : i32
    %c0_i32_0 = arith.constant 0 : i32
    %c0_i32_1 = arith.constant 0 : i32
    return %c0_i32, %c0_i32_0 : i32, i32
  }
  func.func @transform_5(%arg0: i32) -> (i32, i32) {
    %c0_i32 = arith.constant 0 : i32
    %c0_i32_0 = arith.constant 0 : i32
    %c0_i32_1 = arith.constant 0 : i32
    return %c0_i32, %c0_i32_0 : i32, i32
  }
  func.func @transform_6(%arg0: i32) -> (i32, i32) {
    %c0_i32 = arith.constant 0 : i32
    %c0_i32_0 = arith.constant 0 : i32
    %c0_i32_1 = arith.constant 0 : i32
    return %c0_i32, %c0_i32_0 : i32, i32
  }
  func.func @transform_7(%arg0: i32) -> (i32, i32) {
    %c0_i32 = arith.constant 0 : i32
    %c0_i32_0 = arith.constant 0 : i32
    %c0_i32_1 = arith.constant 0 : i32
    return %c0_i32, %c0_i32_0 : i32, i32
  }
  func.func @transform_8(%arg0: i32) -> (i32, i32) {
    %c0_i32 = arith.constant 0 : i32
    %c0_i32_0 = arith.constant 0 : i32
    %c0_i32_1 = arith.constant 0 : i32
    return %c0_i32, %c0_i32_0 : i32, i32
  }
  func.func @transform_9(%arg0: i32) -> (i32, i32) {
    %c0_i32 = arith.constant 0 : i32
    %c0_i32_0 = arith.constant 0 : i32
    %c0_i32_1 = arith.constant 0 : i32
    return %c0_i32, %c0_i32_0 : i32, i32
  }
  func.func @transform_10(%arg0: i32) -> (i32, i32) {
    %c0_i32 = arith.constant 0 : i32
    %c0_i32_0 = arith.constant 0 : i32
    %c0_i32_1 = arith.constant 0 : i32
    return %c0_i32, %c0_i32_0 : i32, i32
  }
  func.func @transform_11(%arg0: i32) -> (i32, i32) {
    %c0_i32 = arith.constant 0 : i32
    %c0_i32_0 = arith.constant 0 : i32
    %c0_i32_1 = arith.constant 0 : i32
    return %c0_i32, %c0_i32_0 : i32, i32
  }
  func.func @transform_12(%arg0: i32) -> (i32, i32) {
    %c0_i32 = arith.constant 0 : i32
    %c0_i32_0 = arith.constant 0 : i32
    %c0_i32_1 = arith.constant 0 : i32
    return %c0_i32, %c0_i32_0 : i32, i32
  }
  func.func @transform_13(%arg0: i32) -> (i32, i32) {
    %c0_i32 = arith.constant 0 : i32
    %c0_i32_0 = arith.constant 0 : i32
    return %arg0, %c0_i32 : i32, i32
  }
}

</mosaic_0001>

<bundles_post_ra>
// kernel: tpu_custom_call.1
= control target key start
LH: loop header
LB: loop body
LE: loop exit
PB: predicated region body
PF: predicated region fallthrough
CT: control target
= control target key end

     0   :  { %s3454_s0 = inlined_call_operand.hbm [shape: bf16[256,128], index: 0, kind: input, shape index: {}]   ;;  %s3455_s1 = inlined_call_operand.hbm [shape: bf16[128,128], index: 1, kind: input, shape index: {}]   ;;  %s3456_s2 = inlined_call_operand.vmem [shape: f32[1,128], index: 2, kind: input, shape index: {}]   ;;  %s3457_s3 = inlined_call_operand.hbm [shape: bf16[128,256], index: 3, kind: input, shape index: {}]   ;;  %s3458_s4 = inlined_call_operand.vmem [shape: f32[1,256], index: 4, kind: input, shape index: {}]   ;;  %s3459_s5 = inlined_call_operand.hbm [shape: bf16[256,128], index: 5, kind: input, shape index: {}]   ;;  %s3460_s6 = inlined_call_operand.vmem [shape: f32[1,128], index: 6, kind: input, shape index: {}]   ;;  %s3461_s7 = inlined_call_operand.hbm [shape: bf16[128,128], index: 7, kind: input, shape index: {}]   ;;  %s3462_s8 = inlined_call_operand.vmem [shape: f32[1,128], index: 8, kind: input, shape index: {}]   ;;  %s3463_s9 = inlined_call_operand.hbm [shape: bf16[128,128], index: 9, kind: input, shape index: {}]   ;;  %s3464_s10 = inlined_call_operand.vmem [shape: f32[1,128], index: 10, kind: input, shape index: {}]   ;;  %s3465_s11 = inlined_call_operand.hbm [shape: bf16[128,128], index: 11, kind: input, shape index: {}]   ;;  %s3466_s12 = inlined_call_operand.vmem [shape: f32[1,128], index: 12, kind: input, shape index: {}]   ;;  %s3467_s13 = inlined_call_operand.hbm [shape: bf16[256,128], index: 13, kind: output, shape index: {}]  }
   0x1   :  { %3479 = sst [smem:[#allocation23_spill]] %s3455_s1 }
   0x2   :  { %3480 = sst [smem:[#allocation24_spill]] %s3457_s3 }
   0x3   :  { %3481 = sst [smem:[#allocation25_spill]] %s3459_s5 }
   0x4   :  { %3482 = sst [smem:[#allocation26_spill]] %s3461_s7 }
   0x5   :  { %3483 = sst [smem:[#allocation27_spill]] %s3463_s9 }
   0x6   :  { %3484 = sst [smem:[#allocation28_spill]] %s3465_s11 }
   0x7   :  { %18 = vsyncpa [#allocation3], 0 }
   0x8   :  { %20 = vsyncpa [#allocation3 + $0x1], 0 }
   0x9   :  { %21 = vsyncpa [#allocation6], 0 }
   0xa   :  { %22 = vsyncpa [#allocation9], 0 }
   0xb   :  { %23 = vsyncpa [#allocation12], 0 }
   0xc   :  { %24 = vsyncpa [#allocation4], 0 }
   0xd   :  { %26 = vsyncpa [#allocation4 + $0x1], 0  ;;  %s3087_s25 = smov 0   ;;  %s3089_s26 = smov 0  }
   0xe   :  { %s3091_s27 = smov 0   ;;  %s3093_s28 = smov 0  }
   0xf LB: > { %3485 = sst [smem:[#allocation20_spill]] %s2996_s27  ;;  %s3002_s29 = smov [#allocation5]   ;;  %s3000_s28 = sphi %s3093_s28, %s3515_s28   ;;  %s2996_s27 = sphi %s3091_s27, %s3517_s27   ;;  %s2992_s26 = sphi %s3089_s26, %s3519_s26   ;;  %s2988_s25 = sphi %s3087_s25, %s3518_s25  }
  0x10   : > { %s353_s30 = sshll.u32 %s3002_s29, 4  ;;  %s3108_s14 = sadd.s32 4294967295, %s3000_s28   ;;  %s354_s30 = int_to_ptr.vmem [resolvable:$true] %s353_s30 }
  0x11   : > { %p2107_p0 = scmp.ge.s32.totalorder %s3000_s28, 1  ;;  %p3473_p1 = scmp.eq.s32.totalorder %s3108_s14, 0 }
  0x12   : > { %p341_p2 = scmp.lt.s32.totalorder %s3000_s28, 3  ;;  %s3003_s16 = smov [#allocation8]  }
  0x13   : > { %s385_s17 = sshll.u32 %s3003_s16, 4  ;;  %s3004_s19 = smov [#allocation11]   ;;  %s3126_s17 = int_to_ptr.vmem [resolvable:$true] %s385_s17 }
  0x14   : > { %p3113_p3 = pnand %p2107_p0, %p341_p2  ;;  %s417_s20 = sshll.u32 %s3004_s19, 4  ;;  %s3128_s20 = int_to_ptr.vmem [resolvable:$true] %s417_s20 }
  0x15   : > { %s2751_s22 = scalar_lea.vmem %s354_s30, 1024  ;;  %p2759_p11 = scmp.lt.s32.totalorder %s354_s30, %s354_s30 }
  0x16   : > { %s3486_s15 = scalar_select %p3113_p3, 1, 0 }
  0x17   : > { %p2574_p5 = pneg %p3113_p3  ;;  %p2752_p8 = scmp.ne.s32.totalorder %s354_s30, %s2751_s22 }
  0x18   : > { %p2760_p12 = scmp.lt.s32.totalorder %s2751_s22, %s2751_s22 }
  0x19   : > { %p3122_p6 = pnand %p2574_p5, %p3473_p1 }
  0x1a   : > { %p2761_p13 = por %p2760_p12, %p2759_p11 }
  0x1b   : > { %p3132_p7 = pneg %p3122_p6 }
  0x1d   : > { %p2754_p9 = pnand %p2752_p8, %p3132_p7 }
  0x1f   : > { %p2755_p10 = pneg %p2754_p9 }
  0x21   : > { %p2762_p0 = pnand %p2761_p13, %p2755_p10 }
  0x23   : > { %2765 = shalt.err (!%p2762_p0)
}
  0x24   : > { %s3468_s23 = smov 64   ;;  %s3470_s24 = smov 4  }
  0x25   : > { %s3489_s1 = sld [smem:[#allocation23_spill]]  ;;  %s2777_s19 = scalar_lea.vmem %s3126_s17, 2048 }
  0x26   : > { %p2778_p2 = scmp.ne.s32.totalorder %s3126_s17, %s2777_s19  ;;  %p2785_p9 = scmp.lt.s32.totalorder %s3126_s17, %s3126_s17 }
  0x27   : > { %p2786_p10 = scmp.lt.s32.totalorder %s2777_s19, %s2777_s19 }
  0x28   : > { %p2780_p5 = pnand %p2778_p2, %p3132_p7 }
  0x29   : > { %p2787_p11 = por %p2786_p10, %p2785_p9 }
  0x2a   : > { %p2781_p8 = pneg %p2780_p5 }
  0x2b   : > { %2577 = dma.hbm_to_vmem [thread:$0]  (!%p3122_p6), %s3489_s1, 1024, %s354_s30, [#allocation6], %s3468_s23, %s3468_s23, %s3470_s24  }
  0x2c   : > { %p2788_p12 = pnand %p2787_p11, %p2781_p8 }
  0x2e   : > { %2791 = shalt.err (!%p2788_p12)
}
  0x2f   : > { %s3490_s5 = sld [smem:[#allocation25_spill]]  ;;  %s2803_s30 = scalar_lea.vmem %s3128_s20, 1024 }
  0x30   : > { %p2804_p13 = scmp.ne.s32.totalorder %s3128_s20, %s2803_s30  ;;  %p2811_p5 = scmp.lt.s32.totalorder %s3128_s20, %s3128_s20 }
  0x31   : > { %p2812_p8 = scmp.lt.s32.totalorder %s2803_s30, %s2803_s30 }
  0x32   : > { %p2806_p0 = pnand %p2804_p13, %p3132_p7 }
  0x33   : > { %p2813_p9 = por %p2812_p8, %p2811_p5 }
  0x34   : > { %p2807_p2 = pneg %p2806_p0 }
  0x35   : > { %2583 = dma.hbm_to_vmem [thread:$0]  (!%p3122_p6), %s3490_s5, 2048, %s3126_s17, [#allocation9], %s3468_s23, %s3468_s23, %s3470_s24  }
  0x36   : > { %p2814_p10 = pnand %p2813_p9, %p2807_p2 }
  0x38   : > { %2817 = shalt.err (!%p2814_p10)
}
  0x39   : > { %s3491_s9 = sld [smem:[#allocation27_spill]]  ;;  %s3007_s17 = smov [#allocation7]  }
  0x3a   : > { %s369_s22 = sshll.u32 %s3007_s17, 4  ;;  %s370_s22 = int_to_ptr.vmem [resolvable:$true] %s369_s22 }
  0x3b   : > { %s2829_s29 = scalar_lea.vmem %s370_s22, 2048  ;;  %p2837_p0 = scmp.lt.s32.totalorder %s370_s22, %s370_s22 }
  0x3c   : > { %p2830_p11 = scmp.ne.s32.totalorder %s370_s22, %s2829_s29  ;;  %p2838_p2 = scmp.lt.s32.totalorder %s2829_s29, %s2829_s29 }
  0x3e   : > { %p2832_p12 = pnand %p2830_p11, %p3132_p7  ;;  %p2839_p5 = por %p2838_p2, %p2837_p0 }
  0x3f   : > { %2589 = dma.hbm_to_vmem [thread:$0]  (!%p3122_p6), %s3491_s9, 1024, %s3128_s20, [#allocation12], %s3468_s23, %s3468_s23, %s3470_s24  }
  0x40   : > { %p2833_p13 = pneg %p2832_p12 }
  0x42   : > { %p2840_p8 = pnand %p2839_p5, %p2833_p13 }
  0x44   : > { %2843 = shalt.err (!%p2840_p8)
}
  0x45   : > { %s3008_s30 = smov 128   ;;  %s3009_s1 = smov 8  }
  0x46   : > { %s3492_s3 = sld [smem:[#allocation24_spill]]  ;;  %s3010_s19 = smov [#allocation10]  }
  0x47   : > { %s401_s17 = sshll.u32 %s3010_s19, 4  ;;  %s3011_s23 = smov [#allocation13]   ;;  %s402_s17 = int_to_ptr.vmem [resolvable:$true] %s401_s17 }
  0x48   : > { %s433_s24 = sshll.u32 %s3011_s23, 4  ;;  %s2855_s5 = scalar_lea.vmem %s402_s17, 1024  ;;  %s434_s24 = int_to_ptr.vmem [resolvable:$true] %s433_s24 }
  0x49   : > { %p2856_p9 = scmp.ne.s32.totalorder %s402_s17, %s2855_s5  ;;  %p2863_p12 = scmp.lt.s32.totalorder %s402_s17, %s402_s17 }
  0x4a   : > { %p2864_p13 = scmp.lt.s32.totalorder %s2855_s5, %s2855_s5 }
  0x4b   : > { %p2858_p10 = pnand %p2856_p9, %p3132_p7 }
  0x4c   : > { %2580 = dma.hbm_to_vmem [thread:$0]  (!%p3122_p6), %s3492_s3, 2048, %s370_s22, [#allocation6], %s3008_s30, %s3008_s30, %s3009_s1  }
  0x4d   : > { %p2859_p11 = pneg %p2858_p10  ;;  %p2865_p0 = por %p2864_p13, %p2863_p12 }
  0x4f   : > { %p2866_p2 = pnand %p2865_p0, %p2859_p11 }
  0x51   : > { %2869 = shalt.err (!%p2866_p2)
}
  0x52   : > { %s3493_s29 = smov 4   ;;  %s3494_s1 = smov 64  }
  0x53   : > { %s3495_s7 = sld [smem:[#allocation26_spill]]  ;;  %s2881_s23 = scalar_lea.vmem %s434_s24, 1024 }
  0x54   : > { %p2882_p5 = scmp.ne.s32.totalorder %s434_s24, %s2881_s23  ;;  %p2889_p10 = scmp.lt.s32.totalorder %s434_s24, %s434_s24 }
  0x55   : > { %p2890_p4 = scmp.lt.s32.totalorder %s2881_s23, %s2881_s23 }
  0x56   : > { %p2884_p8 = pnand %p2882_p5, %p3132_p7 }
  0x57   : > { %p2891_p12 = por %p2890_p4, %p2889_p10 }
  0x58   : > { %p2885_p9 = pneg %p2884_p8 }
  0x59   : > { %2586 = dma.hbm_to_vmem [thread:$0]  (!%p3122_p6), %s3495_s7, 1024, %s402_s17, [#allocation9], %s3494_s1, %s3494_s1, %s3493_s29  }
  0x5a   : > { %p2892_p11 = pnand %p2891_p12, %p2885_p9 }
  0x5c   : > { %2895 = shalt.err (!%p2892_p11)
}
  0x5d   : > { %s3496_s11 = sld [smem:[#allocation28_spill]]  ;;  %s2106_s18 = sadd.s32 4294967294, %s3000_s28  }
  0x5e   : > { %s3205_s21 = sadd.s32 1, %s3000_s28   ;;  %s39_s19 = sadd.s32 1, %s2996_s27 }
  0x5f   : > { %3497 = sst [smem:[#allocation21_spill]] %s3205_s21  ;;  %s36_s20 = ssub.s32 %s3000_s28, %s3205_s21 }
  0x60   : > { %p37_p4 = scmp.eq.s32.totalorder %s36_s20, 0  ;;  %p46_p7 = scmp.ne.s32.totalorder %s2996_s27, %s2992_s26 }
  0x61   : > { %p47_p13 = scmp.eq.s32.totalorder %s3000_s28, 0  ;;  %p52_p0 = scmp.ne.s32.totalorder %s2992_s26, %s2988_s25 }
  0x62   : > { %s3216_s17 = scalar_select %p37_p4, %s2996_s27, %s39_s19  }
  0x63   : > { %2592 = dma.hbm_to_vmem [thread:$0]  (!%p3122_p6), %s3496_s11, 1024, %s434_s24, [#allocation12], %s3494_s1, %s3494_s1, %s3493_s29  }
  0x64   : > { %3498 = sst [smem:[#allocation22_spill]] %s3216_s17  ;;  %p3218_p2 = por %p47_p13, %p46_p7 }
  0x65   : > { %p3224_p6 = por %p3473_p1, %p52_p0  ;;  %p328_p5 = scmp.eq.s32.totalorder %s3108_s14, 1 }
  0x66   : > { %p334_p8 = scmp.eq.s32.totalorder %s2106_s18, 1  ;;  %p2607_p9 = scmp.lt.s32.totalorder %s3000_s28, 2 }
  0x67   : > { %s3500_s24 = scalar_select %p3224_p6, 1, 0 }
  0x68   : > { %s450_s30 = sand.u32 1, %s2996_s27   ;;  %p3231_p10 = por %p328_p5, %p46_p7 }
  0x69   : > { %p3235_p12 = por %p334_p8, %p52_p0  ;;  %s2115_s16 = sshll.u32 %s450_s30, 6 }
  0x6a   : > { %s3501_s23 = scalar_select %p3231_p10, 1, 0 }
  0x6b   : > { %s3502_s5 = scalar_select %p3235_p12, 1, 0 }
  0x6c   : > { %s2225_s20 = sshll.u32 %s3000_s28, 10  ;;  %s454_s18 = scalar_lea.vmem [#allocation2], %s2115_s16 }
  0x6d   : > { %s3243_s7 = scalar_lea.hbm %s3454_s0, %s2225_s20  ;;  %s461_s9 = sshll.u32 %s454_s18, 4  ;;  %s3245_s9 = int_to_ptr.vmem [resolvable:$true] %s461_s9 }
  0x6e   : > { %p3249_p11 = pnand %p2607_p9, %p3218_p2  ;;  %s3253_s17 = scalar_lea.sflag [#allocation3], %s450_s30 }
  0x6f   : > { %s2896_s27 = scalar_lea.hbm %s3243_s7, 1024  ;;  %s2901_s16 = scalar_lea.hbm %s3454_s0, 2048 }
  0x70   : > { %p2897_p4 = scmp.ne.s32.totalorder %s3243_s7, %s2896_s27  ;;  %p2898_p7 = pneg %p3249_p11 }
  0x71   : > { %p2902_p2 = scmp.lt.s32.totalorder %s3243_s7, %s3454_s0  ;;  %p2903_p5 = scmp.lt.s32.totalorder %s2901_s16, %s2896_s27 }
  0x72   : > { %p2899_p13 = pnand %p2898_p7, %p2897_p4 }
  0x73   : > { %p2904_p8 = por %p2903_p5, %p2902_p2 }
  0x74   : > { %p2900_p0 = pneg %p2899_p13 }
  0x76   : > { %p2905_p9 = pnand %p2904_p8, %p2900_p0 }
  0x78   : > { %2908 = shalt.err (!%p2905_p9)
}
  0x79   : > { %s2909_s22 = scalar_lea.vmem %s3245_s9, 1024  ;;  %s3012_s30 = smov [#allocation2]  }
  0x7a   : > { %p2910_p1 = scmp.ne.s32.totalorder %s3245_s9, %s2909_s22  ;;  %s2914_s21 = sshll.u32 %s3012_s30, 4  ;;  %s2915_s21 = int_to_ptr.vmem [resolvable:$false] %s2914_s21 }
  0x7b   : > { %s2916_s3 = scalar_lea.vmem %s2915_s21, 2048  ;;  %p2917_p13 = scmp.lt.s32.totalorder %s3245_s9, %s2915_s21 }
  0x7c   : > { %p2912_p12 = pnand %p2910_p1, %p2898_p7  ;;  %p2918_p10 = scmp.lt.s32.totalorder %s2916_s3, %s2909_s22 }
  0x7e   : > { %p2913_p4 = pneg %p2912_p12  ;;  %p2919_p6 = por %p2918_p10, %p2917_p13 }
  0x80   : > { %p2920_p3 = pnand %p2919_p6, %p2913_p4 }
  0x82   : > { %2923 = shalt.err (!%p2920_p3)
}
  0x83   : > { %2596 = dma.hbm_to_vmem [thread:$0]  (!%p3249_p11), %s3243_s7, 1024, %s3245_s9, %s3253_s17, %s3494_s1, %s3494_s1, %s3493_s29  }
  0x84   : > { %p3504_p1 = scmp.ne.s32.totalorder %s3486_s15, 0 }
  0x85   : > { %s3280_s27 = sand.u32 (!%p3504_p1), 1, %s2992_s26   ;;  %p3505_p3 = scmp.ne.s32.totalorder (!%p3504_p1), %s3500_s24, 0 }
  0x86   : > { %473 = sbr.rel (%p3504_p1) target bundleno = 1485 (0x5cd), region = 72  ;;  %s2119_s21 = sshll.u32 (!%p3504_p1), %s3280_s27, 6 }
  0x87   : > { %s476_s20 = scalar_lea.sflag (!%p3504_p1), [#allocation3], %s3280_s27  ;;  %s3286_s11 = scalar_lea.vmem (!%p3504_p1), [#allocation2], %s2119_s21 }
  0x8b   : > { %2967 = dma.done.wait (%p3505_p3), %s476_s20, 1024  }
  0x8c   : > { %2969 = vsyncadd (%p3505_p3), %s476_s20, 4294966272  ;;  %p3506_p6 = scmp.eq.s32.totalorder %s3108_s14, 0 }
  0x8e   : > { %2971 = dma.done.wait (%p3506_p6), [#allocation6], 3072   ;;  %p3507_p10 = pmov %p3506_p6 }
  0x8f   : > { %p3508_p12 = pmov %p3506_p6 }
  0x90   : > { %2973 = vsyncadd (%p3507_p10), [#allocation6], 4294964224 }
  0x91   : > { %2975 = dma.done.wait (%p3508_p12), [#allocation9], 3072   ;;  %p3509_p11 = pmov %p3506_p6 }
  0x92   : > { %p3510_p7 = pmov %p3506_p6 }
  0x93   : > { %2977 = vsyncadd (%p3509_p11), [#allocation9], 4294964224 }
  0x94   : > { %2979 = dma.done.wait (%p3510_p7), [#allocation12], 2048   ;;  %p3511_p0 = pmov %p3506_p6 }
  0x95   : > { %v2660_v0 = vld [vmem:[#allocation5 + $0x38] sm:$0xff]   ;;  %v2661_v1 = vld [vmem:[#allocation5 + $0x30] sm:$0xff]   ;;  %v2662_v2 = vld [vmem:[#allocation5 + $0x28] sm:$0xff]   ;;  %v3013_v32 = vmov 0   ;;  %s3394_s3 = scalar_lea.vmem [#allocation14], %s2119_s21  ;;  %s2242_s20 = sshll.u32 %s3108_s14, 10 }
  0x96   : > { %2981 = vsyncadd (%p3511_p0), [#allocation12], 4294965248  ;;  %2418 = vmatprep.subr.bf16.mxu0 %v2660_v0  ;;  %v2663_v3 = vld [vmem:[#allocation5 + $0x20] sm:$0xff]   ;;  %v2664_v5 = vld [vmem:[#allocation5 + $0x18] sm:$0xff]   ;;  %945 = vmatprep.mubr.bf16.mxu1 %v3013_v32  ;;  %s1976_s21 = sshll.u32 %s3394_s3, 4  ;;  %s3409_s9 = scalar_lea.hbm %s3467_s13, %s2242_s20  ;;  %s3404_s21 = int_to_ptr.vmem [resolvable:$true] %s1976_s21 }
  0x97   : > { %2419 = vmatpush3.bf16.msra.mxu0 %v2660_v0  ;;  %v2668_v4 = vld [vmem:[%s3286_s11] sm:$0xff]   ;;  %v2665_v6 = vld [vmem:[#allocation5 + $0x10] sm:$0xff]   ;;  %v2666_v10 = vld [vmem:[#allocation5 + $0x8] sm:$0xff]   ;;  %s1963_s15 = scalar_lea.sflag [#allocation4], %s3280_s27  ;;  %s2924_s29 = scalar_lea.vmem %s3404_s21, 1024 }
  0x98   : > { %2420 = vmatprep.subr.bf16.mxu0 %v2661_v1  ;;  %2434 = vmatprep.mubr.bf16.mxu0 %v2668_v4  ;;  %v2676_v7 = vld [vmem:[#allocation7 + $0x74] ss:$8 sps:$4 sm:$0xff]   ;;  %v2678_v8 = vld [vmem:[#allocation7 + $0x70] ss:$8 sps:$4 sm:$0xff]   ;;  %v2679_v9 = vld [vmem:[#allocation7 + $0x64] ss:$8 sps:$4 sm:$0xff]   ;;  %p2925_p2 = scmp.ne.s32.totalorder %s3404_s21, %s2924_s29 }
  0x99   : > { %913 = vmatprep.subr.bf16.mxu1 %v2676_v7  ;;  %v2681_v11 = vld [vmem:[#allocation7 + $0x60] ss:$8 sps:$4 sm:$0xff]   ;;  %v2682_v12 = vld [vmem:[#allocation7 + $0x54] ss:$8 sps:$4 sm:$0xff]   ;;  %v2684_v14 = vld [vmem:[#allocation7 + $0x50] ss:$8 sps:$4 sm:$0xff]  }
  0x9a   : > { %914 = vmatpush1.bf16.msra.mxu1 %v2678_v8  ;;  %v2667_v13 = vld [vmem:[#allocation5] sm:$0xff]   ;;  %v2688_v17 = vld [vmem:[#allocation7 + $0x34] ss:$8 sps:$4 sm:$0xff]   ;;  %v2669_v18 = vld [vmem:[%s3286_s11 + $0x8] sm:$0xff]   ;;  %p3512_p5 = scmp.ne.s32.totalorder %s3501_s23, 0  ;;  %s3014_s14 = smov [#allocation14]  }
  0x9b   : > { %2421 = vmatpush3.bf16.msra.mxu0 %v2661_v1  ;;  %915 = vmatprep.subr.bf16.mxu1 %v2679_v9  ;;  %v2685_v15 = vld [vmem:[#allocation7 + $0x44] ss:$8 sps:$4 sm:$0xff]   ;;  %v2687_v16 = vld [vmem:[#allocation7 + $0x40] ss:$8 sps:$4 sm:$0xff]   ;;  %v2670_v19 = vld [vmem:[%s3286_s11 + $0x10] sm:$0xff]   ;;  %s2928_s1 = sshll.u32 %s3014_s14, 4  ;;  %s2929_s1 = int_to_ptr.vmem [resolvable:$false] %s2928_s1 }
  0x9c   : > { %2422 = vmatprep.subr.bf16.mxu0 %v2662_v2  ;;  %v2690_v20 = vld [vmem:[#allocation7 + $0x30] ss:$8 sps:$4 sm:$0xff]   ;;  %v2672_v22 = vld [vmem:[%s3286_s11 + $0x20] sm:$0xff]   ;;  %v2673_v23 = vld [vmem:[%s3286_s11 + $0x28] sm:$0xff]   ;;  %p2926_p8 = pnand %p2925_p2, %p3512_p5  ;;  %s2930_s17 = scalar_lea.vmem %s2929_s1, 2048 }
  0x9d   : > { %v2671_v21 = vld [vmem:[%s3286_s11 + $0x18] sm:$0xff]   ;;  %v2674_v24 = vld [vmem:[%s3286_s11 + $0x30] sm:$0xff]   ;;  %v2691_v26 = vld [vmem:[#allocation7 + $0x24] ss:$8 sps:$4 sm:$0xff]   ;;  %p2931_p4 = scmp.lt.s32.totalorder %s3404_s21, %s2929_s1  ;;  %p2932_p13 = scmp.lt.s32.totalorder %s2930_s17, %s2924_s29 }
  0x9e   : > { %916 = vmatpush1.bf16.msra.mxu1 %v2681_v11  ;;  %v2675_v25 = vld [vmem:[%s3286_s11 + $0x38] sm:$0xff]   ;;  %v2693_v27 = vld [vmem:[#allocation7 + $0x20] ss:$8 sps:$4 sm:$0xff]   ;;  %v2697_v30 = vld [vmem:[#allocation7 + $0x4] ss:$8 sps:$4 sm:$0xff]   ;;  %p2927_p9 = pneg %p2926_p8 }
  0x9f   : > { %2423 = vmatpush3.bf16.msra.mxu0 %v2662_v2  ;;  %917 = vmatprep.subr.bf16.mxu1 %v2682_v12  ;;  %v2694_v28 = vld [vmem:[#allocation7 + $0x14] ss:$8 sps:$4 sm:$0xff]   ;;  %v2696_v29 = vld [vmem:[#allocation7 + $0x10] ss:$8 sps:$4 sm:$0xff]   ;;  %v2699_v31 = vld [vmem:[#allocation7] ss:$8 sps:$4 sm:$0xff]   ;;  %p2933_p1 = por %p2932_p13, %p2931_p4 }
  0xa0   : > { %2424 = vmatprep.subr.bf16.mxu0 %v2663_v3  ;;  %v2700_v33 = vld [vmem:[#allocation8 + $0x78] sm:$0xff]   ;;  %v2702_v35 = vld [vmem:[#allocation8 + $0x70] sm:$0xff]   ;;  %v2704_v37 = vld [vmem:[#allocation8 + $0x68] sm:$0xff]  }
  0xa1   : > { %v2701_v34 = vld [vmem:[#allocation8 + $0x38] sm:$0xff]   ;;  %v2703_v36 = vld [vmem:[#allocation8 + $0x30] sm:$0xff]   ;;  %v2705_v38 = vld [vmem:[#allocation8 + $0x28] sm:$0xff]   ;;  %p2934_p3 = pnand %p2933_p1, %p2927_p9 }
  0xa2   : > { %918 = vmatpush1.bf16.msra.mxu1 %v2684_v14  ;;  %v2706_v39 = vld [vmem:[#allocation8 + $0x60] sm:$0xff]   ;;  %v2708_v41 = vld [vmem:[#allocation8 + $0x58] sm:$0xff]  }
  0xa3   : > { %2425 = vmatpush3.bf16.msra.mxu0 %v2663_v3  ;;  %919 = vmatprep.subr.bf16.mxu1 %v2685_v15  ;;  %v2707_v40 = vld [vmem:[#allocation8 + $0x20] sm:$0xff]   ;;  %v2709_v42 = vld [vmem:[#allocation8 + $0x18] sm:$0xff]  }
  0xa4   : > { %2426 = vmatprep.subr.bf16.mxu0 %v2664_v5  ;;  %v2127_v45 = vld [vmem:[%s3456_s2] ss:$0 sm:$0xff] }
  0xa6   : > { %920 = vmatpush1.bf16.msra.mxu1 %v2687_v16 }
  0xa7   : > { %2427 = vmatpush3.bf16.msra.mxu0 %v2664_v5  ;;  %921 = vmatprep.subr.bf16.mxu1 %v2688_v17 }
  0xa8   : > { %2428 = vmatprep.subr.bf16.mxu0 %v2665_v6 }
  0xaa   : > { %922 = vmatpush1.bf16.msra.mxu1 %v2690_v20 }
  0xab   : > { %2429 = vmatpush3.bf16.msra.mxu0 %v2665_v6  ;;  %923 = vmatprep.subr.bf16.mxu1 %v2691_v26 }
  0xac   : > { %2430 = vmatprep.subr.bf16.mxu0 %v2666_v10 }
  0xae   : > { %924 = vmatpush1.bf16.msra.mxu1 %v2693_v27 }
  0xaf   : > { %2431 = vmatpush3.bf16.msra.mxu0 %v2666_v10  ;;  %925 = vmatprep.subr.bf16.mxu1 %v2694_v28 }
  0xb0   : > { %2432 = vmatprep.subr.bf16.mxu0 %v2667_v13 }
  0xb2   : > { %926 = vmatpush1.bf16.msra.mxu1 %v2696_v29 }
  0xb3   : > { %2433 = vmatpush3.bf16.msra.mxu0 %v2667_v13  ;;  %927 = vmatprep.subr.bf16.mxu1 %v2697_v30 }
  0xb4   : > { %2306 = vmatprep.subr.bf16.mxu0 %v2700_v33 }
  0xb6   : > { %2435 = vmatmul.mubr.bf16.vlgmr.msra.gmra.mxu0 %v2669_v18  ;;  %928 = vmatpush1.bf16.msra.mxu1 %v2699_v31 }
  0xb7   : > { %2438 = vmatprep.mubr.bf16.mxu0 %v2670_v19  ;;  %2307 = vmatpush3.bf16.msra.mxu0 %v2701_v34 }
  0xb8   : > { %2308 = vmatprep.subr.bf16.mxu0 %v2702_v35 }
  0xbb   : > { %2309 = vmatpush3.bf16.msra.mxu0 %v2703_v36 }
  0xbc   : > { %2310 = vmatprep.subr.bf16.mxu0 %v2704_v37  ;;  %v2710_v37 = vld [vmem:[#allocation8 + $0x50] sm:$0xff]  }
  0xbe   : > { %2439 = vmatmul.mubr.bf16.gmra.mxu0 %v2671_v21 }
  0xbf   : > { %2442 = vmatprep.mubr.bf16.mxu0 %v2672_v22  ;;  %2311 = vmatpush3.bf16.msra.mxu0 %v2705_v38  ;;  %v2711_v38 = vld [vmem:[#allocation8 + $0x10] sm:$0xff]  }
  0xc0   : > { %2312 = vmatprep.subr.bf16.mxu0 %v2706_v39  ;;  %v2712_v39 = vld [vmem:[#allocation8 + $0x48] sm:$0xff]  }
  0xc3   : > { %2313 = vmatpush3.bf16.msra.mxu0 %v2707_v40  ;;  %v2713_v40 = vld [vmem:[#allocation8 + $0x8] sm:$0xff]  }
  0xc4   : > { %2314 = vmatprep.subr.bf16.mxu0 %v2708_v41  ;;  %v2714_v41 = vld [vmem:[#allocation8 + $0x40] sm:$0xff]  }
  0xc6   : > { %2443 = vmatmul.mubr.bf16.gmra.mxu0 %v2673_v23 }
  0xc7   : > { %2446 = vmatprep.mubr.bf16.mxu0 %v2674_v24  ;;  %2315 = vmatpush3.bf16.msra.mxu0 %v2709_v42  ;;  %v2715_v42 = vld [vmem:[#allocation8] sm:$0xff]  }
  0xc8   : > { %2316 = vmatprep.subr.bf16.mxu0 %v2710_v37 }
  0xcb   : > { %2317 = vmatpush3.bf16.msra.mxu0 %v2711_v38 }
  0xcc   : > { %2318 = vmatprep.subr.bf16.mxu0 %v2712_v39 }
  0xce   : > { %2447 = vmatmul.mubr.bf16.gmra.mxu0 %v2675_v25 }
  0xcf   : > { %2319 = vmatpush3.bf16.msra.mxu0 %v2713_v40 }
  0xd0   : > { %2320 = vmatprep.subr.bf16.mxu0 %v2714_v41 }
  0xd3   : > { %2321 = vmatpush3.bf16.msra.mxu0 %v2715_v42 }
 0x176   : > { %v2436_v43 = vpop.f32.mrf.mxu0 }
 0x177   : > { %v727_v57 = vadd.f32 %v2436_v43, %v2127_v45  ;;  %v2716_v43 = vld [vmem:[#allocation10 + $0x38] sm:$0xff]  }
 0x178   : > { %v718_v44 = vpop.f32.mrf.mxu0  ;;  %2450 = vmatprep.subr.bf16.mxu1 %v2716_v43 }
 0x179   : > { %v719_v47 = vadd.f32 %v2127_v45, %v718_v44  ;;  %v783_v60 = vmax.f32 %v727_v57, 0.0  ;;  %v2717_v44 = vld [vmem:[#allocation10 + $0x30] sm:$0xff]  }
 0x17a   : > { %v2437_v46 = vpop.f32.mrf.mxu0 }
 0x17b   : > { %v781_v51 = vmax.f32 %v719_v47, 0.0  ;;  %v730_v54 = vadd.f32 %v2437_v46, %v2127_v45 }
 0x17c   : > { %v721_v48 = vpop.f32.mrf.mxu0 }
 0x17d   : > { %v722_v49 = vadd.f32 %v2127_v45, %v721_v48  ;;  %v784_v58 = vmax.f32 %v730_v54, 0.0 }
 0x17e   : > { %v2440_v50 = vpop.f32.mrf.mxu0 }
 0x17f   : > { %v782_v52 = vmax.f32 %v722_v49, 0.0  ;;  %v798_v61 = vpack.c.bf16 %v784_v58, %v783_v60  ;;  %v743_v4 = vadd.f32 %v2440_v50, %v2127_v45  ;;  %v821_v49 = vld [vmem:[%s3458_s4] sm:$0x3] }
 0x180   : > { %v734_v53 = vpop.f32.mrf.mxu0 }
 0x181   : > { %v797_v55 = vpack.c.bf16 %v782_v52, %v781_v51  ;;  %v735_v62 = vadd.f32 %v2127_v45, %v734_v53  ;;  %v787_v8 = vmax.f32 %v743_v4, 0.0 }
 0x182   : > { %v2441_v56 = vpop.f32.mrf.mxu0 }
 0x183   : > { %946 = vmatmul.mubr.bf16.vlgmr.msra.gmra.mxu1 %v797_v55  ;;  %v785_v1 = vmax.f32 %v735_v62, 0.0  ;;  %v746_v5 = vadd.f32 %v2441_v56, %v2127_v45 }
 0x184   : > { %955 = vmatprep.mubr.bf16.mxu1 %v3013_v32  ;;  %v737_v59 = vpop.f32.mrf.mxu0  ;;  %2451 = vmatpush3.bf16.msra.mxu1 %v2716_v43 }
 0x185   : > { %v738_v63 = vadd.f32 %v2127_v45, %v737_v59  ;;  %v788_v9 = vmax.f32 %v746_v5, 0.0  ;;  %2452 = vmatprep.subr.bf16.mxu1 %v2717_v44 }
 0x186   : > { %v2444_v0 = vpop.f32.mrf.mxu0 }
 0x187   : > { %v786_v2 = vmax.f32 %v738_v63, 0.0  ;;  %v800_v11 = vpack.c.bf16 %v788_v9, %v787_v8  ;;  %v759_v18 = vadd.f32 %v2444_v0, %v2127_v45 }
 0x188   : > { %v750_v3 = vpop.f32.mrf.mxu0  ;;  %2453 = vmatpush3.bf16.msra.mxu1 %v2717_v44 }
 0x189   : > { %v799_v6 = vpack.c.bf16 %v786_v2, %v785_v1  ;;  %v751_v12 = vadd.f32 %v2127_v45, %v750_v3  ;;  %v791_v22 = vmax.f32 %v759_v18, 0.0 }
 0x18a   : > { %v2445_v7 = vpop.f32.mrf.mxu0 }
 0x18b   : > { %956 = vmatmul.mubr.bf16.gmra.mxu1 %v798_v61  ;;  %v789_v15 = vmax.f32 %v751_v12, 0.0  ;;  %v762_v19 = vadd.f32 %v2445_v7, %v2127_v45 }
 0x18c   : > { %965 = vmatprep.mubr.bf16.mxu1 %v3013_v32  ;;  %v753_v10 = vpop.f32.mrf.mxu0 }
 0x18d   : > { %v754_v13 = vadd.f32 %v2127_v45, %v753_v10  ;;  %v792_v23 = vmax.f32 %v762_v19, 0.0 }
 0x18e   : > { %v2448_v14 = vpop.f32.mrf.mxu0 }
 0x18f   : > { %v790_v16 = vmax.f32 %v754_v13, 0.0  ;;  %v802_v25 = vpack.c.bf16 %v792_v23, %v791_v22  ;;  %v775_v30 = vadd.f32 %v2448_v14, %v2127_v45 }
 0x190   : > { %v766_v17 = vpop.f32.mrf.mxu0 }
 0x191   : > { %v801_v20 = vpack.c.bf16 %v790_v16, %v789_v15  ;;  %v767_v26 = vadd.f32 %v2127_v45, %v766_v17  ;;  %v795_v34 = vmax.f32 %v775_v30, 0.0 }
 0x192   : > { %v2449_v21 = vpop.f32.mrf.mxu0 }
 0x193   : > { %966 = vmatmul.mubr.bf16.gmra.mxu1 %v799_v6  ;;  %v793_v28 = vmax.f32 %v767_v26, 0.0  ;;  %v778_v31 = vadd.f32 %v2449_v21, %v2127_v45 }
 0x194   : > { %975 = vmatprep.mubr.bf16.mxu1 %v3013_v32  ;;  %v769_v24 = vpop.f32.mrf.mxu0 }
 0x195   : > { %v770_v27 = vadd.f32 %v2127_v45, %v769_v24  ;;  %v796_v35 = vmax.f32 %v778_v31, 0.0  ;;  %v823_v45 = vlaneseq }
 0x197   : > { %v794_v29 = vmax.f32 %v770_v27, 0.0  ;;  %v804_v36 = vpack.c.bf16 %v796_v35, %v795_v34  ;;  %v824_v46 = vshrl.u32 %v823_v45, 7 }
 0x199   : > { %v803_v33 = vpack.c.bf16 %v794_v29, %v793_v28  ;;  %v829_v47 = vsub.s32 1, %v824_v46  ;;  %v825_v48 = vsub.s32 0, %v824_v46 }
 0x19b   : > { %976 = vmatmul.mubr.bf16.gmra.mxu1 %v800_v11  ;;  %v3326_v51 = vrot.slane %v821_v49, %v829_v47  ;;  %v3328_v52 = vrot.slane %v821_v49, %v825_v48 }
 0x19c   : > { %985 = vmatprep.mubr.bf16.mxu1 %v3013_v32 }
 0x1a3   : > { %986 = vmatmul.mubr.bf16.gmra.mxu1 %v801_v20 }
 0x1a4   : > { %995 = vmatprep.mubr.bf16.mxu1 %v3013_v32 }
 0x1ab   : > { %996 = vmatmul.mubr.bf16.gmra.mxu1 %v802_v25 }
 0x1ac   : > { %1005 = vmatprep.mubr.bf16.mxu1 %v3013_v32 }
 0x1b3   : > { %1006 = vmatmul.mubr.bf16.gmra.mxu1 %v803_v33 }
 0x1b4   : > { %1015 = vmatprep.mubr.bf16.mxu1 %v3013_v32  ;;  %v2718_v32 = vld [vmem:[#allocation10 + $0x28] sm:$0xff]  }
 0x1b5   : > { %2454 = vmatprep.subr.bf16.mxu1 %v2718_v32 }
 0x1b6   : > { %2455 = vmatpush3.bf16.msra.mxu1 %v2718_v32 }
 0x1bb   : > { %1016 = vmatmul.mubr.bf16.gmra.mxu1 %v804_v36 }
 0x243   : > { %v947_v50 = vpop.f32.mrf.mxu1 }
 0x244   : > { %v948_v57 = vadd.f32 %v947_v50, %v3328_v52 }
 0x245   : > { %v949_v53 = vpop.f32.mrf.mxu1 }
 0x246   : > { %v950_v55 = vadd.f32 %v949_v53, %v3326_v51  ;;  %v1026_v0 = vmax.f32 %v948_v57, 0.0 }
 0x247   : > { %v951_v54 = vpop.f32.mrf.mxu1 }
 0x248   : > { %v952_v56 = vadd.f32 %v951_v54, %v3328_v52  ;;  %v1027_v62 = vmax.f32 %v950_v55, 0.0 }
 0x249   : > { %v953_v58 = vpop.f32.mrf.mxu1 }
 0x24a   : > { %v954_v59 = vadd.f32 %v953_v58, %v3326_v51  ;;  %v1028_v60 = vmax.f32 %v952_v56, 0.0 }
 0x24b   : > { %v957_v61 = vpop.f32.mrf.mxu1 }
 0x24c   : > { %v1029_v63 = vmax.f32 %v954_v59, 0.0  ;;  %v1058_v3 = vpack.c.bf16 %v1028_v60, %v1026_v0  ;;  %v958_v7 = vadd.f32 %v957_v61, %v3328_v52 }
 0x24d   : > { %v959_v1 = vpop.f32.mrf.mxu1 }
 0x24e   : > { %v1059_v2 = vpack.c.bf16 %v1029_v63, %v1027_v62  ;;  %v960_v5 = vadd.f32 %v959_v1, %v3326_v51  ;;  %v1030_v14 = vmax.f32 %v958_v7, 0.0 }
 0x24f   : > { %v961_v4 = vpop.f32.mrf.mxu1 }
 0x250   : > { %v962_v6 = vadd.f32 %v961_v4, %v3328_v52  ;;  %1241 = vmatprep.mubr.bf16.mxu0 %v1059_v2  ;;  %v1031_v12 = vmax.f32 %v960_v5, 0.0 }
 0x251   : > { %v963_v8 = vpop.f32.mrf.mxu1  ;;  %1242 = vmatmul.mubr.bf16.vlgmr.msra.gmra.mxu0 %v1058_v3 }
 0x252   : > { %v964_v9 = vadd.f32 %v963_v8, %v3326_v51  ;;  %v1032_v10 = vmax.f32 %v962_v6, 0.0 }
 0x253   : > { %v967_v11 = vpop.f32.mrf.mxu1 }
 0x254   : > { %v1033_v13 = vmax.f32 %v964_v9, 0.0  ;;  %v1060_v17 = vpack.c.bf16 %v1032_v10, %v1030_v14  ;;  %v968_v21 = vadd.f32 %v967_v11, %v3328_v52 }
 0x255   : > { %v969_v15 = vpop.f32.mrf.mxu1 }
 0x256   : > { %v1061_v16 = vpack.c.bf16 %v1033_v13, %v1031_v12  ;;  %v970_v19 = vadd.f32 %v969_v15, %v3326_v51  ;;  %v1034_v28 = vmax.f32 %v968_v21, 0.0 }
 0x257   : > { %v971_v18 = vpop.f32.mrf.mxu1 }
 0x258   : > { %v972_v20 = vadd.f32 %v971_v18, %v3328_v52  ;;  %1249 = vmatprep.mubr.bf16.mxu0 %v1061_v16  ;;  %v1035_v26 = vmax.f32 %v970_v19, 0.0 }
 0x259   : > { %v973_v22 = vpop.f32.mrf.mxu1  ;;  %1250 = vmatmul.mubr.bf16.gmra.mxu0 %v1060_v17 }
 0x25a   : > { %v974_v23 = vadd.f32 %v973_v22, %v3326_v51  ;;  %v1036_v24 = vmax.f32 %v972_v20, 0.0 }
 0x25b   : > { %v977_v25 = vpop.f32.mrf.mxu1 }
 0x25c   : > { %v1037_v27 = vmax.f32 %v974_v23, 0.0  ;;  %v1062_v31 = vpack.c.bf16 %v1036_v24, %v1034_v28  ;;  %v978_v36 = vadd.f32 %v977_v25, %v3328_v52 }
 0x25d   : > { %v979_v29 = vpop.f32.mrf.mxu1 }
 0x25e   : > { %v1063_v30 = vpack.c.bf16 %v1037_v27, %v1035_v26  ;;  %v980_v34 = vadd.f32 %v979_v29, %v3326_v51  ;;  %v1038_v43 = vmax.f32 %v978_v36, 0.0 }
 0x25f   : > { %v981_v33 = vpop.f32.mrf.mxu1 }
 0x260   : > { %v982_v35 = vadd.f32 %v981_v33, %v3328_v52  ;;  %1257 = vmatprep.mubr.bf16.mxu0 %v1063_v30  ;;  %v1039_v41 = vmax.f32 %v980_v34, 0.0 }
 0x261   : > { %v983_v37 = vpop.f32.mrf.mxu1  ;;  %1258 = vmatmul.mubr.bf16.gmra.mxu0 %v1062_v31 }
 0x262   : > { %v984_v38 = vadd.f32 %v983_v37, %v3326_v51  ;;  %v1040_v39 = vmax.f32 %v982_v35, 0.0 }
 0x263   : > { %v987_v40 = vpop.f32.mrf.mxu1 }
 0x264   : > { %v1041_v42 = vmax.f32 %v984_v38, 0.0  ;;  %v1064_v45 = vpack.c.bf16 %v1040_v39, %v1038_v43  ;;  %v988_v49 = vadd.f32 %v987_v40, %v3328_v52  ;;  %v2719_v39 = vld [vmem:[#allocation10 + $0x20] sm:$0xff]   ;;  %v2720_v40 = vld [vmem:[#allocation10 + $0x18] sm:$0xff]   ;;  %v2725_v43 = vld [vmem:[#allocation11 + $0x30] sm:$0xff]  }
 0x265   : > { %v989_v44 = vpop.f32.mrf.mxu1  ;;  %2456 = vmatprep.subr.bf16.mxu1 %v2719_v39 }
 0x266   : > { %v1065_v32 = vpack.c.bf16 %v1041_v42, %v1039_v41  ;;  %v990_v47 = vadd.f32 %v989_v44, %v3326_v51  ;;  %v1042_v58 = vmax.f32 %v988_v49, 0.0  ;;  %2457 = vmatpush3.bf16.msra.mxu1 %v2719_v39  ;;  %v2721_v41 = vld [vmem:[#allocation10 + $0x10] sm:$0xff]   ;;  %v2724_v42 = vld [vmem:[#allocation11 + $0x38] sm:$0xff]   ;;  %v2726_v44 = vld [vmem:[#allocation11 + $0x28] sm:$0xff]  }
 0x267   : > { %v991_v46 = vpop.f32.mrf.mxu1  ;;  %2458 = vmatprep.subr.bf16.mxu1 %v2720_v40  ;;  %2482 = vmatprep.subr.bf16.mxu0 %v2724_v42  ;;  %v3365_v49 = vld [vmem:[%s3460_s6] ss:$0 sm:$0xff] }
 0x268   : > { %v992_v48 = vadd.f32 %v991_v46, %v3328_v52  ;;  %1265 = vmatprep.mubr.bf16.mxu0 %v1065_v32  ;;  %v1043_v56 = vmax.f32 %v990_v47, 0.0  ;;  %2483 = vmatpush3.bf16.msra.mxu0 %v2724_v42  ;;  %v2727_v32 = vld [vmem:[#allocation11 + $0x20] sm:$0xff]  }
 0x269   : > { %v993_v50 = vpop.f32.mrf.mxu1  ;;  %1266 = vmatmul.mubr.bf16.gmra.mxu0 %v1064_v45  ;;  %2484 = vmatprep.subr.bf16.mxu0 %v2725_v43  ;;  %v2728_v45 = vld [vmem:[#allocation11 + $0x18] sm:$0xff]  }
 0x26a   : > { %v994_v53 = vadd.f32 %v993_v50, %v3326_v51  ;;  %v1044_v54 = vmax.f32 %v992_v48, 0.0  ;;  %2459 = vmatpush3.bf16.msra.mxu1 %v2720_v40 }
 0x26b   : > { %v997_v55 = vpop.f32.mrf.mxu1  ;;  %2460 = vmatprep.subr.bf16.mxu1 %v2721_v41 }
 0x26c   : > { %v1045_v57 = vmax.f32 %v994_v53, 0.0  ;;  %v1066_v61 = vpack.c.bf16 %v1044_v54, %v1042_v58  ;;  %v998_v1 = vadd.f32 %v997_v55, %v3328_v52  ;;  %2485 = vmatpush3.bf16.msra.mxu0 %v2725_v43 }
 0x26d   : > { %v999_v59 = vpop.f32.mrf.mxu1  ;;  %2486 = vmatprep.subr.bf16.mxu0 %v2726_v44 }
 0x26e   : > { %v1067_v60 = vpack.c.bf16 %v1045_v57, %v1043_v56  ;;  %v1000_v63 = vadd.f32 %v999_v59, %v3326_v51  ;;  %v1046_v8 = vmax.f32 %v998_v1, 0.0  ;;  %2461 = vmatpush3.bf16.msra.mxu1 %v2721_v41 }
 0x26f   : > { %v1001_v62 = vpop.f32.mrf.mxu1 }
 0x270   : > { %v1002_v0 = vadd.f32 %v1001_v62, %v3328_v52  ;;  %1273 = vmatprep.mubr.bf16.mxu0 %v1067_v60  ;;  %v1047_v6 = vmax.f32 %v1000_v63, 0.0  ;;  %2487 = vmatpush3.bf16.msra.mxu0 %v2726_v44 }
 0x271   : > { %v1003_v2 = vpop.f32.mrf.mxu1  ;;  %1274 = vmatmul.mubr.bf16.gmra.mxu0 %v1066_v61  ;;  %2488 = vmatprep.subr.bf16.mxu0 %v2727_v32 }
 0x272   : > { %v1004_v3 = vadd.f32 %v1003_v2, %v3326_v51  ;;  %v1048_v4 = vmax.f32 %v1002_v0, 0.0 }
 0x273   : > { %v1007_v5 = vpop.f32.mrf.mxu1 }
 0x274   : > { %v1049_v7 = vmax.f32 %v1004_v3, 0.0  ;;  %v1068_v11 = vpack.c.bf16 %v1048_v4, %v1046_v8  ;;  %v1008_v15 = vadd.f32 %v1007_v5, %v3328_v52  ;;  %2489 = vmatpush3.bf16.msra.mxu0 %v2727_v32 }
 0x275   : > { %v1009_v9 = vpop.f32.mrf.mxu1  ;;  %2490 = vmatprep.subr.bf16.mxu0 %v2728_v45 }
 0x276   : > { %v1069_v10 = vpack.c.bf16 %v1049_v7, %v1047_v6  ;;  %v1010_v13 = vadd.f32 %v1009_v9, %v3326_v51  ;;  %v1050_v22 = vmax.f32 %v1008_v15, 0.0 }
 0x277   : > { %v1011_v12 = vpop.f32.mrf.mxu1 }
 0x278   : > { %v1012_v14 = vadd.f32 %v1011_v12, %v3328_v52  ;;  %1281 = vmatprep.mubr.bf16.mxu0 %v1069_v10  ;;  %v1051_v20 = vmax.f32 %v1010_v13, 0.0  ;;  %2491 = vmatpush3.bf16.msra.mxu0 %v2728_v45 }
 0x279   : > { %v1013_v16 = vpop.f32.mrf.mxu1  ;;  %1282 = vmatmul.mubr.bf16.gmra.mxu0 %v1068_v11 }
 0x27a   : > { %v1014_v17 = vadd.f32 %v1013_v16, %v3326_v51  ;;  %v1052_v18 = vmax.f32 %v1012_v14, 0.0 }
 0x27b   : > { %v1017_v19 = vpop.f32.mrf.mxu1 }
 0x27c   : > { %v1053_v21 = vmax.f32 %v1014_v17, 0.0  ;;  %v1070_v25 = vpack.c.bf16 %v1052_v18, %v1050_v22  ;;  %v1018_v29 = vadd.f32 %v1017_v19, %v3328_v52 }
 0x27d   : > { %v1019_v23 = vpop.f32.mrf.mxu1 }
 0x27e   : > { %v1071_v24 = vpack.c.bf16 %v1053_v21, %v1051_v20  ;;  %v1020_v27 = vadd.f32 %v1019_v23, %v3326_v51  ;;  %v1054_v36 = vmax.f32 %v1018_v29, 0.0 }
 0x27f   : > { %v1021_v26 = vpop.f32.mrf.mxu1 }
 0x280   : > { %v1022_v28 = vadd.f32 %v1021_v26, %v3328_v52  ;;  %1289 = vmatprep.mubr.bf16.mxu0 %v1071_v24  ;;  %v1055_v34 = vmax.f32 %v1020_v27, 0.0  ;;  %v2722_v52 = vld [vmem:[#allocation10 + $0x8] sm:$0xff]  }
 0x281   : > { %v1023_v30 = vpop.f32.mrf.mxu1  ;;  %1290 = vmatmul.mubr.bf16.gmra.mxu0 %v1070_v25  ;;  %2462 = vmatprep.subr.bf16.mxu1 %v2722_v52 }
 0x282   : > { %v1024_v31 = vadd.f32 %v1023_v30, %v3326_v51  ;;  %v1056_v33 = vmax.f32 %v1022_v28, 0.0  ;;  %2463 = vmatpush3.bf16.msra.mxu1 %v2722_v52  ;;  %v2723_v51 = vld [vmem:[#allocation10] sm:$0xff]  }
 0x283   : > { %2464 = vmatprep.subr.bf16.mxu1 %v2723_v51 }
 0x284   : > { %v1057_v35 = vmax.f32 %v1024_v31, 0.0  ;;  %v1072_v38 = vpack.c.bf16 %v1056_v33, %v1054_v36 }
 0x286   : > { %v1073_v37 = vpack.c.bf16 %v1057_v35, %v1055_v34  ;;  %2465 = vmatpush3.bf16.msra.mxu1 %v2723_v51 }
 0x288   : > { %1297 = vmatprep.mubr.bf16.mxu0 %v1073_v37 }
 0x289   : > { %1298 = vmatmul.mubr.bf16.gmra.mxu0 %v1072_v38 }
 0x311   : > { %v2322_v46 = vpop.f32.mrf.mxu0 }
 0x313   : > { %v2323_v47 = vpop.f32.mrf.mxu0 }
 0x314   : > { %v2324_v48 = vadd.f32 %v2323_v47, %v2322_v46 }
 0x315   : > { %v2325_v50 = vpop.f32.mrf.mxu0 }
 0x316   : > { %v1244_v54 = vadd.f32 %v2324_v48, %v3365_v49 }
 0x317   : > { %v2326_v53 = vpop.f32.mrf.mxu0 }
 0x318   : > { %v2327_v55 = vadd.f32 %v2326_v53, %v2325_v50  ;;  %v1306_v59 = vmax.f32 %v1244_v54, 0.0 }
 0x319   : > { %v2328_v56 = vpop.f32.mrf.mxu0 }
 0x31a   : > { %v1247_v57 = vadd.f32 %v2327_v55, %v3365_v49 }
 0x31b   : > { %v2329_v58 = vpop.f32.mrf.mxu0 }
 0x31c   : > { %v1307_v60 = vmax.f32 %v1247_v57, 0.0  ;;  %v2330_v61 = vadd.f32 %v2329_v58, %v2328_v56 }
 0x31d   : > { %v2331_v62 = vpop.f32.mrf.mxu0 }
 0x31e   : > { %v1322_v63 = vpack.c.bf16 %v1307_v60, %v1306_v59  ;;  %v1252_v1 = vadd.f32 %v2330_v61, %v3365_v49 }
 0x31f   : > { %v2332_v0 = vpop.f32.mrf.mxu0 }
 0x320   : > { %v2333_v2 = vadd.f32 %v2332_v0, %v2331_v62  ;;  %2466 = vmatprep.mubr.bf16.mxu1 %v1322_v63  ;;  %v1308_v6 = vmax.f32 %v1252_v1, 0.0 }
 0x321   : > { %v2334_v3 = vpop.f32.mrf.mxu0 }
 0x322   : > { %v1255_v4 = vadd.f32 %v2333_v2, %v3365_v49 }
 0x323   : > { %v2335_v5 = vpop.f32.mrf.mxu0 }
 0x324   : > { %v1309_v7 = vmax.f32 %v1255_v4, 0.0  ;;  %v2336_v8 = vadd.f32 %v2335_v5, %v2334_v3 }
 0x325   : > { %v2337_v9 = vpop.f32.mrf.mxu0 }
 0x326   : > { %v1323_v10 = vpack.c.bf16 %v1309_v7, %v1308_v6  ;;  %v1260_v12 = vadd.f32 %v2336_v8, %v3365_v49 }
 0x327   : > { %v2338_v11 = vpop.f32.mrf.mxu0 }
 0x328   : > { %v2339_v13 = vadd.f32 %v2338_v11, %v2337_v9  ;;  %2467 = vmatmul.mubr.bf16.vlgmr.msra.gmra.mxu1 %v1323_v10  ;;  %v1310_v17 = vmax.f32 %v1260_v12, 0.0  ;;  %v2729_v10 = vld [vmem:[#allocation11 + $0x10] sm:$0xff]   ;;  %v2730_v11 = vld [vmem:[#allocation11 + $0x8] sm:$0xff]   ;;  %v2731_v12 = vld [vmem:[#allocation11] sm:$0xff]  }
 0x329   : > { %v2340_v14 = vpop.f32.mrf.mxu0  ;;  %2492 = vmatprep.subr.bf16.mxu0 %v2729_v10 }
 0x32a   : > { %v1263_v15 = vadd.f32 %v2339_v13, %v3365_v49  ;;  %2493 = vmatpush3.bf16.msra.mxu0 %v2729_v10  ;;  %v2732_v13 = vld [vmem:[#allocation13 + $0x38] sm:$0xff]  }
 0x32b   : > { %v2341_v16 = vpop.f32.mrf.mxu0  ;;  %2494 = vmatprep.subr.bf16.mxu0 %v2730_v11  ;;  %2514 = vmatprep.subr.bf16.mxu1 %v2732_v13 }
 0x32c   : > { %v1311_v18 = vmax.f32 %v1263_v15, 0.0  ;;  %v2342_v19 = vadd.f32 %v2341_v16, %v2340_v14  ;;  %v2733_v14 = vld [vmem:[#allocation13 + $0x30] sm:$0xff]   ;;  %2515 = vmatpush3.bf16.msra.mxu1 %v2732_v13  ;;  %v2734_v15 = vld [vmem:[#allocation13 + $0x28] sm:$0xff]   ;;  %v2736_v16 = vld [vmem:[#allocation13 + $0x18] sm:$0xff]  }
 0x32d   : > { %v2343_v20 = vpop.f32.mrf.mxu0  ;;  %2516 = vmatprep.subr.bf16.mxu1 %v2733_v14  ;;  %v2739_v13 = vld [vmem:[#allocation13] sm:$0xff]  }
 0x32e   : > { %v1324_v21 = vpack.c.bf16 %v1311_v18, %v1310_v17  ;;  %v1268_v23 = vadd.f32 %v2342_v19, %v3365_v49  ;;  %2495 = vmatpush3.bf16.msra.mxu0 %v2730_v11  ;;  %v2177_v19 = vld [vmem:[%s3462_s8] ss:$0 sm:$0xff]  ;;  %v2737_v11 = vld [vmem:[#allocation13 + $0x10] sm:$0xff]  }
 0x32f   : > { %v2344_v22 = vpop.f32.mrf.mxu0  ;;  %2496 = vmatprep.subr.bf16.mxu0 %v2731_v12 }
 0x330   : > { %v2345_v24 = vadd.f32 %v2344_v22, %v2343_v20  ;;  %2470 = vmatprep.mubr.bf16.mxu1 %v1324_v21  ;;  %v1312_v28 = vmax.f32 %v1268_v23, 0.0  ;;  %2517 = vmatpush3.bf16.msra.mxu1 %v2733_v14 }
 0x331   : > { %v2346_v25 = vpop.f32.mrf.mxu0  ;;  %2518 = vmatprep.subr.bf16.mxu1 %v2734_v15 }
 0x332   : > { %v1271_v26 = vadd.f32 %v2345_v24, %v3365_v49  ;;  %2497 = vmatpush3.bf16.msra.mxu0 %v2731_v12  ;;  %v2738_v12 = vld [vmem:[#allocation13 + $0x8] sm:$0xff]  }
 0x333   : > { %v2347_v27 = vpop.f32.mrf.mxu0 }
 0x334   : > { %v1313_v29 = vmax.f32 %v1271_v26, 0.0  ;;  %v2348_v30 = vadd.f32 %v2347_v27, %v2346_v25  ;;  %2519 = vmatpush3.bf16.msra.mxu1 %v2734_v15 }
 0x335   : > { %v2349_v31 = vpop.f32.mrf.mxu0 }
 0x336   : > { %v1325_v33 = vpack.c.bf16 %v1313_v29, %v1312_v28  ;;  %v1276_v35 = vadd.f32 %v2348_v30, %v3365_v49 }
 0x337   : > { %v2350_v34 = vpop.f32.mrf.mxu0 }
 0x338   : > { %v2351_v36 = vadd.f32 %v2350_v34, %v2349_v31  ;;  %2471 = vmatmul.mubr.bf16.gmra.mxu1 %v1325_v33  ;;  %v1314_v40 = vmax.f32 %v1276_v35, 0.0 }
 0x339   : > { %v2352_v37 = vpop.f32.mrf.mxu0 }
 0x33a   : > { %v1279_v38 = vadd.f32 %v2351_v36, %v3365_v49 }
 0x33b   : > { %v2353_v39 = vpop.f32.mrf.mxu0 }
 0x33c   : > { %v1315_v41 = vmax.f32 %v1279_v38, 0.0  ;;  %v2354_v52 = vadd.f32 %v2353_v39, %v2352_v37 }
 0x33d   : > { %v2355_v51 = vpop.f32.mrf.mxu0 }
 0x33e   : > { %v1326_v42 = vpack.c.bf16 %v1315_v41, %v1314_v40  ;;  %v1284_v44 = vadd.f32 %v2354_v52, %v3365_v49 }
 0x33f   : > { %v2356_v43 = vpop.f32.mrf.mxu0 }
 0x340   : > { %v2357_v32 = vadd.f32 %v2356_v43, %v2355_v51  ;;  %2474 = vmatprep.mubr.bf16.mxu1 %v1326_v42  ;;  %v1316_v48 = vmax.f32 %v1284_v44, 0.0 }
 0x341   : > { %v2358_v45 = vpop.f32.mrf.mxu0 }
 0x342   : > { %v1287_v46 = vadd.f32 %v2357_v32, %v3365_v49 }
 0x343   : > { %v2359_v47 = vpop.f32.mrf.mxu0 }
 0x344   : > { %v1317_v50 = vmax.f32 %v1287_v46, 0.0  ;;  %v2360_v53 = vadd.f32 %v2359_v47, %v2358_v45 }
 0x345   : > { %v2361_v54 = vpop.f32.mrf.mxu0 }
 0x346   : > { %v1327_v55 = vpack.c.bf16 %v1317_v50, %v1316_v48  ;;  %v1292_v57 = vadd.f32 %v2360_v53, %v3365_v49 }
 0x347   : > { %v2362_v56 = vpop.f32.mrf.mxu0 }
 0x348   : > { %v2363_v58 = vadd.f32 %v2362_v56, %v2361_v54  ;;  %2475 = vmatmul.mubr.bf16.gmra.mxu1 %v1327_v55  ;;  %v1318_v62 = vmax.f32 %v1292_v57, 0.0 }
 0x349   : > { %v2364_v59 = vpop.f32.mrf.mxu0 }
 0x34a   : > { %v1295_v60 = vadd.f32 %v2363_v58, %v3365_v49 }
 0x34b   : > { %v2365_v61 = vpop.f32.mrf.mxu0 }
 0x34c   : > { %v1319_v63 = vmax.f32 %v1295_v60, 0.0  ;;  %v2366_v0 = vadd.f32 %v2365_v61, %v2364_v59 }
 0x34d   : > { %v2367_v1 = vpop.f32.mrf.mxu0 }
 0x34e   : > { %v1328_v2 = vpack.c.bf16 %v1319_v63, %v1318_v62  ;;  %v1300_v4 = vadd.f32 %v2366_v0, %v3365_v49 }
 0x34f   : > { %v2368_v3 = vpop.f32.mrf.mxu0 }
 0x350   : > { %v2369_v5 = vadd.f32 %v2368_v3, %v2367_v1  ;;  %2478 = vmatprep.mubr.bf16.mxu1 %v1328_v2  ;;  %v1320_v7 = vmax.f32 %v1300_v4, 0.0 }
 0x352   : > { %v1303_v6 = vadd.f32 %v2369_v5, %v3365_v49  ;;  %v2735_v49 = vld [vmem:[#allocation13 + $0x20] sm:$0xff]  }
 0x353   : > { %2520 = vmatprep.subr.bf16.mxu1 %v2735_v49 }
 0x354   : > { %v1321_v8 = vmax.f32 %v1303_v6, 0.0  ;;  %2521 = vmatpush3.bf16.msra.mxu1 %v2735_v49  ;;  %v2186_v49 = vld [vmem:[%s3464_s10] ss:$0 sm:$0xff] }
 0x355   : > { %2522 = vmatprep.subr.bf16.mxu1 %v2736_v16 }
 0x356   : > { %v1329_v9 = vpack.c.bf16 %v1321_v8, %v1320_v7 }
 0x358   : > { %2479 = vmatmul.mubr.bf16.gmra.mxu1 %v1329_v9 }
 0x359   : > { %2523 = vmatpush3.bf16.msra.mxu1 %v2736_v16 }
 0x35a   : > { %2524 = vmatprep.subr.bf16.mxu1 %v2737_v11 }
 0x35d   : > { %2525 = vmatpush3.bf16.msra.mxu1 %v2737_v11 }
 0x35e   : > { %2526 = vmatprep.subr.bf16.mxu1 %v2738_v12 }
 0x361   : > { %2527 = vmatpush3.bf16.msra.mxu1 %v2738_v12 }
 0x362   : > { %2528 = vmatprep.subr.bf16.mxu1 %v2739_v13 }
 0x365   : > { %2529 = vmatpush3.bf16.msra.mxu1 %v2739_v13 }
 0x3e8   : > { %v2468_v17 = vpop.f32.mrf.mxu1 }
 0x3e9   : > { %v1444_v23 = vadd.f32 %v2468_v17, %v2177_v19 }
 0x3ea   : > { %v1435_v18 = vpop.f32.mrf.mxu1 }
 0x3eb   : > { %v1436_v21 = vadd.f32 %v2177_v19, %v1435_v18  ;;  %v1500_v29 = vmax.f32 %v1444_v23, 0.0 }
 0x3ec   : > { %v2469_v20 = vpop.f32.mrf.mxu1 }
 0x3ed   : > { %v1447_v22 = vadd.f32 %v2469_v20, %v2177_v19  ;;  %v1498_v27 = vmax.f32 %v1436_v21, 0.0 }
 0x3ee   : > { %v1438_v24 = vpop.f32.mrf.mxu1 }
 0x3ef   : > { %v1439_v25 = vadd.f32 %v2177_v19, %v1438_v24  ;;  %v1501_v26 = vmax.f32 %v1447_v22, 0.0 }
 0x3f1   : > { %v1499_v28 = vmax.f32 %v1439_v25, 0.0  ;;  %v1515_v31 = vpack.c.bf16 %v1501_v26, %v1500_v29 }
 0x3f3   : > { %v1514_v30 = vpack.c.bf16 %v1499_v28, %v1498_v27 }
 0x3f5   : > { %2498 = vmatprep.mubr.bf16.mxu0 %v1514_v30 }
 0x3f6   : > { %2499 = vmatmul.mubr.bf16.vlgmr.msra.gmra.mxu0 %v1515_v31 }
 0x3f8   : > { %v2472_v33 = vpop.f32.mrf.mxu1 }
 0x3f9   : > { %v1460_v38 = vadd.f32 %v2472_v33, %v2177_v19 }
 0x3fa   : > { %v1451_v34 = vpop.f32.mrf.mxu1 }
 0x3fb   : > { %v1452_v36 = vadd.f32 %v2177_v19, %v1451_v34  ;;  %v1504_v42 = vmax.f32 %v1460_v38, 0.0 }
 0x3fc   : > { %v2473_v35 = vpop.f32.mrf.mxu1 }
 0x3fd   : > { %v1463_v37 = vadd.f32 %v2473_v35, %v2177_v19  ;;  %v1502_v52 = vmax.f32 %v1452_v36, 0.0 }
 0x3fe   : > { %v1454_v39 = vpop.f32.mrf.mxu1 }
 0x3ff   : > { %v1455_v40 = vadd.f32 %v2177_v19, %v1454_v39  ;;  %v1505_v41 = vmax.f32 %v1463_v37, 0.0 }
 0x401   : > { %v1503_v51 = vmax.f32 %v1455_v40, 0.0  ;;  %v1517_v44 = vpack.c.bf16 %v1505_v41, %v1504_v42 }
 0x403   : > { %v1516_v43 = vpack.c.bf16 %v1503_v51, %v1502_v52 }
 0x405   : > { %2502 = vmatprep.mubr.bf16.mxu0 %v1516_v43 }
 0x406   : > { %2503 = vmatmul.mubr.bf16.gmra.mxu0 %v1517_v44 }
 0x408   : > { %v2476_v32 = vpop.f32.mrf.mxu1 }
 0x409   : > { %v1476_v50 = vadd.f32 %v2476_v32, %v2177_v19 }
 0x40a   : > { %v1467_v45 = vpop.f32.mrf.mxu1 }
 0x40b   : > { %v1468_v47 = vadd.f32 %v2177_v19, %v1467_v45  ;;  %v1508_v58 = vmax.f32 %v1476_v50, 0.0 }
 0x40c   : > { %v2477_v46 = vpop.f32.mrf.mxu1 }
 0x40d   : > { %v1479_v48 = vadd.f32 %v2477_v46, %v2177_v19  ;;  %v1506_v56 = vmax.f32 %v1468_v47, 0.0 }
 0x40e   : > { %v1470_v53 = vpop.f32.mrf.mxu1 }
 0x40f   : > { %v1471_v54 = vadd.f32 %v2177_v19, %v1470_v53  ;;  %v1509_v55 = vmax.f32 %v1479_v48, 0.0 }
 0x411   : > { %v1507_v57 = vmax.f32 %v1471_v54, 0.0  ;;  %v1519_v60 = vpack.c.bf16 %v1509_v55, %v1508_v58 }
 0x413   : > { %v1518_v59 = vpack.c.bf16 %v1507_v57, %v1506_v56 }
 0x415   : > { %2506 = vmatprep.mubr.bf16.mxu0 %v1518_v59 }
 0x416   : > { %2507 = vmatmul.mubr.bf16.gmra.mxu0 %v1519_v60 }
 0x418   : > { %v2480_v61 = vpop.f32.mrf.mxu1 }
 0x419   : > { %v1492_v2 = vadd.f32 %v2480_v61, %v2177_v19 }
 0x41a   : > { %v1483_v62 = vpop.f32.mrf.mxu1 }
 0x41b   : > { %v1484_v0 = vadd.f32 %v2177_v19, %v1483_v62  ;;  %v1512_v8 = vmax.f32 %v1492_v2, 0.0 }
 0x41c   : > { %v2481_v63 = vpop.f32.mrf.mxu1 }
 0x41d   : > { %v1495_v1 = vadd.f32 %v2481_v63, %v2177_v19  ;;  %v1510_v6 = vmax.f32 %v1484_v0, 0.0 }
 0x41e   : > { %v1486_v3 = vpop.f32.mrf.mxu1 }
 0x41f   : > { %v1487_v4 = vadd.f32 %v2177_v19, %v1486_v3  ;;  %v1513_v5 = vmax.f32 %v1495_v1, 0.0 }
 0x421   : > { %v1511_v7 = vmax.f32 %v1487_v4, 0.0  ;;  %v1521_v10 = vpack.c.bf16 %v1513_v5, %v1512_v8  ;;  %v2195_v8 = vld [vmem:[%s3466_s12] ss:$0 sm:$0xff] }
 0x423   : > { %v1520_v9 = vpack.c.bf16 %v1511_v7, %v1510_v6 }
 0x425   : > { %2510 = vmatprep.mubr.bf16.mxu0 %v1520_v9 }
 0x426   : > { %2511 = vmatmul.mubr.bf16.gmra.mxu0 %v1521_v10 }
 0x4b6   : > { %v2500_v14 = vpop.f32.mrf.mxu0 }
 0x4b7   : > { %v1636_v19 = vadd.f32 %v2500_v14, %v2186_v49 }
 0x4b8   : > { %v1627_v15 = vpop.f32.mrf.mxu0 }
 0x4b9   : > { %v1628_v17 = vadd.f32 %v2186_v49, %v1627_v15  ;;  %v1692_v25 = vmax.f32 %v1636_v19, 0.0 }
 0x4ba   : > { %v2501_v16 = vpop.f32.mrf.mxu0 }
 0x4bb   : > { %v1639_v18 = vadd.f32 %v2501_v16, %v2186_v49  ;;  %v1690_v23 = vmax.f32 %v1628_v17, 0.0 }
 0x4bc   : > { %v1630_v20 = vpop.f32.mrf.mxu0 }
 0x4bd   : > { %v1631_v21 = vadd.f32 %v2186_v49, %v1630_v20  ;;  %v1693_v22 = vmax.f32 %v1639_v18, 0.0 }
 0x4bf   : > { %v1691_v24 = vmax.f32 %v1631_v21, 0.0  ;;  %v1707_v27 = vpack.c.bf16 %v1693_v22, %v1692_v25 }
 0x4c1   : > { %v1706_v26 = vpack.c.bf16 %v1691_v24, %v1690_v23 }
 0x4c3   : > { %2530 = vmatprep.mubr.bf16.mxu1 %v1706_v26 }
 0x4c4   : > { %2531 = vmatmul.mubr.bf16.vlgmr.msra.gmra.mxu1 %v1707_v27 }
 0x4c6   : > { %v2504_v28 = vpop.f32.mrf.mxu0 }
 0x4c7   : > { %v1652_v34 = vadd.f32 %v2504_v28, %v2186_v49 }
 0x4c8   : > { %v1643_v29 = vpop.f32.mrf.mxu0 }
 0x4c9   : > { %v1644_v31 = vadd.f32 %v2186_v49, %v1643_v29  ;;  %v1696_v40 = vmax.f32 %v1652_v34, 0.0 }
 0x4ca   : > { %v2505_v30 = vpop.f32.mrf.mxu0 }
 0x4cb   : > { %v1655_v33 = vadd.f32 %v2505_v30, %v2186_v49  ;;  %v1694_v38 = vmax.f32 %v1644_v31, 0.0 }
 0x4cc   : > { %v1646_v35 = vpop.f32.mrf.mxu0 }
 0x4cd   : > { %v1647_v36 = vadd.f32 %v2186_v49, %v1646_v35  ;;  %v1697_v37 = vmax.f32 %v1655_v33, 0.0 }
 0x4cf   : > { %v1695_v39 = vmax.f32 %v1647_v36, 0.0  ;;  %v1709_v52 = vpack.c.bf16 %v1697_v37, %v1696_v40 }
 0x4d1   : > { %v1708_v41 = vpack.c.bf16 %v1695_v39, %v1694_v38 }
 0x4d3   : > { %2534 = vmatprep.mubr.bf16.mxu1 %v1708_v41 }
 0x4d4   : > { %2535 = vmatmul.mubr.bf16.gmra.mxu1 %v1709_v52 }
 0x4d6   : > { %v2508_v51 = vpop.f32.mrf.mxu0 }
 0x4d7   : > { %v1668_v45 = vadd.f32 %v2508_v51, %v2186_v49 }
 0x4d8   : > { %v1659_v42 = vpop.f32.mrf.mxu0 }
 0x4d9   : > { %v1660_v44 = vadd.f32 %v2186_v49, %v1659_v42  ;;  %v1700_v54 = vmax.f32 %v1668_v45, 0.0 }
 0x4da   : > { %v2509_v43 = vpop.f32.mrf.mxu0 }
 0x4db   : > { %v1671_v32 = vadd.f32 %v2509_v43, %v2186_v49  ;;  %v1698_v50 = vmax.f32 %v1660_v44, 0.0 }
 0x4dc   : > { %v1662_v46 = vpop.f32.mrf.mxu0 }
 0x4dd   : > { %v1663_v47 = vadd.f32 %v2186_v49, %v1662_v46  ;;  %v1701_v48 = vmax.f32 %v1671_v32, 0.0 }
 0x4df   : > { %v1699_v53 = vmax.f32 %v1663_v47, 0.0  ;;  %v1711_v56 = vpack.c.bf16 %v1701_v48, %v1700_v54 }
 0x4e1   : > { %v1710_v55 = vpack.c.bf16 %v1699_v53, %v1698_v50 }
 0x4e3   : > { %2538 = vmatprep.mubr.bf16.mxu1 %v1710_v55 }
 0x4e4   : > { %2539 = vmatmul.mubr.bf16.gmra.mxu1 %v1711_v56 }
 0x4e6   : > { %v2512_v57 = vpop.f32.mrf.mxu0 }
 0x4e7   : > { %v1684_v62 = vadd.f32 %v2512_v57, %v2186_v49 }
 0x4e8   : > { %v1675_v58 = vpop.f32.mrf.mxu0 }
 0x4e9   : > { %v1676_v60 = vadd.f32 %v2186_v49, %v1675_v58  ;;  %v1704_v4 = vmax.f32 %v1684_v62, 0.0 }
 0x4ea   : > { %v2513_v59 = vpop.f32.mrf.mxu0 }
 0x4eb   : > { %v1687_v61 = vadd.f32 %v2513_v59, %v2186_v49  ;;  %v1702_v2 = vmax.f32 %v1676_v60, 0.0 }
 0x4ec   : > { %v1678_v63 = vpop.f32.mrf.mxu0 }
 0x4ed   : > { %v1679_v0 = vadd.f32 %v2186_v49, %v1678_v63  ;;  %v1705_v1 = vmax.f32 %v1687_v61, 0.0 }
 0x4ef   : > { %v1703_v3 = vmax.f32 %v1679_v0, 0.0  ;;  %v1713_v6 = vpack.c.bf16 %v1705_v1, %v1704_v4 }
 0x4f1   : > { %v1712_v5 = vpack.c.bf16 %v1703_v3, %v1702_v2 }
 0x4f3   : > { %2542 = vmatprep.mubr.bf16.mxu1 %v1712_v5 }
 0x4f4   : > { %2543 = vmatmul.mubr.bf16.gmra.mxu1 %v1713_v6 }
 0x584   : > { %v2532_v7 = vpop.f32.mrf.mxu1 }
 0x585   : > { %v1828_v11 = vadd.f32 %v2532_v7, %v2195_v8 }
 0x586   : > { %v1819_v9 = vpop.f32.mrf.mxu1 }
 0x587   : > { %v1820_v14 = vadd.f32 %v2195_v8, %v1819_v9 }
 0x588   : > { %v2533_v10 = vpop.f32.mrf.mxu1 }
 0x589   : > { %v1831_v12 = vadd.f32 %v2533_v10, %v2195_v8 }
 0x58a   : > { %v1822_v13 = vpop.f32.mrf.mxu1 }
 0x58b   : > { %v2251_v15 = vpack.c.bf16 %v1831_v12, %v1828_v11  ;;  %v1823_v49 = vadd.f32 %v2195_v8, %v1822_v13 }
 0x58d   : > { %2283 = vst [vmem:[%s3394_s3 + $0x8] sm:$0xff] %v2251_v15   ;;  %v2246_v16 = vpack.c.bf16 %v1823_v49, %v1820_v14 }
 0x58f   : > { %2247 = vst [vmem:[%s3394_s3] sm:$0xff] %v2246_v16  }
 0x594   : > { %v2536_v17 = vpop.f32.mrf.mxu1 }
 0x595   : > { %v1844_v20 = vadd.f32 %v2536_v17, %v2195_v8 }
 0x596   : > { %v1835_v18 = vpop.f32.mrf.mxu1 }
 0x597   : > { %v1836_v23 = vadd.f32 %v2195_v8, %v1835_v18 }
 0x598   : > { %v2537_v19 = vpop.f32.mrf.mxu1 }
 0x599   : > { %v1847_v21 = vadd.f32 %v2537_v19, %v2195_v8 }
 0x59a   : > { %v1838_v22 = vpop.f32.mrf.mxu1 }
 0x59b   : > { %v2261_v24 = vpack.c.bf16 %v1847_v21, %v1844_v20  ;;  %v1839_v25 = vadd.f32 %v2195_v8, %v1838_v22 }
 0x59d   : > { %2285 = vst [vmem:[%s3394_s3 + $0x18] sm:$0xff] %v2261_v24   ;;  %v2256_v26 = vpack.c.bf16 %v1839_v25, %v1836_v23 }
 0x59f   : > { %2284 = vst [vmem:[%s3394_s3 + $0x10] sm:$0xff] %v2256_v26  }
 0x5a4   : > { %v2540_v27 = vpop.f32.mrf.mxu1 }
 0x5a5   : > { %v1860_v30 = vadd.f32 %v2540_v27, %v2195_v8 }
 0x5a6   : > { %v1851_v28 = vpop.f32.mrf.mxu1 }
 0x5a7   : > { %v1852_v34 = vadd.f32 %v2195_v8, %v1851_v28 }
 0x5a8   : > { %v2541_v29 = vpop.f32.mrf.mxu1 }
 0x5a9   : > { %v1863_v31 = vadd.f32 %v2541_v29, %v2195_v8 }
 0x5aa   : > { %v1854_v33 = vpop.f32.mrf.mxu1 }
 0x5ab   : > { %v2271_v35 = vpack.c.bf16 %v1863_v31, %v1860_v30  ;;  %v1855_v36 = vadd.f32 %v2195_v8, %v1854_v33 }
 0x5ad   : > { %2287 = vst [vmem:[%s3394_s3 + $0x28] sm:$0xff] %v2271_v35   ;;  %v2266_v37 = vpack.c.bf16 %v1855_v36, %v1852_v34 }
 0x5af   : > { %2286 = vst [vmem:[%s3394_s3 + $0x20] sm:$0xff] %v2266_v37  }
 0x5b4   : > { %v2544_v38 = vpop.f32.mrf.mxu1 }
 0x5b5   : > { %v1876_v41 = vadd.f32 %v2544_v38, %v2195_v8 }
 0x5b6   : > { %v1867_v39 = vpop.f32.mrf.mxu1 }
 0x5b7   : > { %v1868_v42 = vadd.f32 %v2195_v8, %v1867_v39 }
 0x5b8   : > { %v2545_v40 = vpop.f32.mrf.mxu1 }
 0x5b9   : > { %v1879_v52 = vadd.f32 %v2545_v40, %v2195_v8 }
 0x5ba   : > { %v1870_v51 = vpop.f32.mrf.mxu1 }
 0x5bb   : > { %v2281_v43 = vpack.c.bf16 %v1879_v52, %v1876_v41  ;;  %v1871_v44 = vadd.f32 %v2195_v8, %v1870_v51 }
 0x5bd   : > { %2289 = vst [vmem:[%s3394_s3 + $0x38] sm:$0xff] %v2281_v43   ;;  %v2276_v32 = vpack.c.bf16 %v1871_v44, %v1868_v42 }
 0x5bf   : > { %2288 = vst [vmem:[%s3394_s3 + $0x30] sm:$0xff] %v2276_v32  }
 0x5c0   : > { %2937 = shalt.err (!%p2934_p3)
}
 0x5c1   : > { %s2938_s24 = scalar_lea.hbm %s3409_s9, 1024  ;;  %s2942_s18 = scalar_lea.hbm %s3467_s13, 2048 }
 0x5c2   : > { %p2939_p6 = scmp.ne.s32.totalorder %s3409_s9, %s2938_s24  ;;  %p2943_p11 = scmp.lt.s32.totalorder %s3409_s9, %s3467_s13 }
 0x5c3   : > { %p2944_p7 = scmp.lt.s32.totalorder %s2942_s18, %s2938_s24 }
 0x5c4   : > { %p2940_p10 = pnand %p2939_p6, %p3512_p5 }
 0x5c5   : > { %p2945_p0 = por %p2944_p7, %p2943_p11 }
 0x5c6   : > { %p2941_p12 = pneg %p2940_p10 }
 0x5c8   : > { %p2946_p2 = pnand %p2945_p0, %p2941_p12 }
 0x5ca   : > { %2949 = shalt.err (!%p2946_p2)
}
 0x5cb   : > { %s3015_s3 = smov 64   ;;  %s3016_s20 = smov 4  }
 0x5cc   : > { %2572 = dma.vmem_to_hbm [thread:$0]  (%p3512_p5), %s3404_s21, 1024, %s3409_s9, %s1963_s15, %s3015_s3, %s3015_s3, %s3016_s20  }
 0x5cd PF: > { %s1991_s11 = sand.u32 1, %s2988_s25   ;;  %p3513_p8 = scmp.ne.s32.totalorder %s3502_s5, 0 }
 0x5ce   : > { %p3514_p9 = scmp.ge.s32.totalorder %s3000_s28, 2  ;;  %s1992_s7 = scalar_lea.sflag [#allocation4], %s1991_s11 }
 0x5d0   : > { %p2598_p4 = pnand %p3514_p9, %p3513_p8 }
 0x5d2   : > { %p2599_p13 = pneg %p2598_p4 }
 0x5d4   : > { %2983 = dma.done.wait (%p2599_p13), %s1992_s7, 1024  }
 0x5d5   : > { %2985 = vsyncadd (%p2599_p13), %s1992_s7, 4294966272  ;;  %s3515_s28 = sld [smem:[#allocation21_spill]]  ;;  %s3518_s25 = smov %s2992_s26 }
 0x5d6   : > { %s3516_s29 = sld [smem:[#allocation20_spill]] }
 0x5d7   : > { %s3517_s27 = sld [smem:[#allocation22_spill]] }
 0x5db   : > { %p29_p1 = scmp.ge.s32.totalorder %s3515_s28, 4  }
 0x5dc   : > { %s3519_s26 = smov %s3516_s29 }
 0x5dd   :  { %31 = sbr.rel (!%p29_p1) target bundleno = 15 (0xf), region = 141 }
 0x5e2   :  { %1997 = vsyncpa [#allocation3], 1 }
 0x5e3   :  { %1999 = vsyncpa [#allocation3 + $0x1], 1 }
 0x5e4   :  { %2000 = vsyncpa [#allocation6], 1 }
 0x5e5   :  { %2001 = vsyncpa [#allocation9], 1 }
 0x5e6   :  { %2002 = vsyncpa [#allocation12], 1 }
 0x5e7   :  { %2003 = vsyncpa [#allocation4], 1 }
 0x5e8   :  { %2005 = vsyncpa [#allocation4 + $0x1], 1 }

</bundles_post_ra>
